<compile_context>
chip_gen: v6e
topology: v6e:2x2x1
jax: 0.10.0
libtpu: 0.0.40
codegen_flags: <defaults>
</compile_context>

<pallas_src>
import functools

import numpy as np
import jax
import jax.numpy as jnp
from jax.experimental import pallas as pl
from jax.experimental.pallas import tpu as pltpu


def conv_output_size(input_size, kernel_size, stride, padding, dilation):
    # mirrors the PyTorch helper (integer floor division)
    return tuple(
        (s + 2 * padding - dilation * (kernel_size - 1) - 1) // stride + 1
        for s in input_size
    )


def _round_up(x, m):
    return ((x + m - 1) // m) * m


def _vmem_limit_bytes():
    """Generation-aware scoped-VMEM limit: half of physical VMEM, capped at 64 MiB."""
    cap = 64 * 1024 * 1024
    try:
        info_cap = pltpu.get_tpu_info().vmem_capacity_bytes
        if isinstance(info_cap, (int, np.integer)) and int(info_cap) > 0:
            cap = int(info_cap)
    except Exception:
        pass
    return int(min(cap // 2, 64 * 1024 * 1024))


def _pick_lane_tile(length, bytes_per_lane, budget_bytes):
    """Largest lane tile covering the (128-rounded) length whose double-buffered
    block bytes stay under the VMEM budget."""
    # TODO(synk): fall back to splitting channels across the grid when even a
    # 128-lane block exceeds the budget (instead of returning 128 regardless).
    cap = _round_up(max(length, 1), 128)
    for t in (2048, 1024, 512, 256, 128):
        if t <= cap and t * bytes_per_lane <= budget_bytes:
            return t
    return 128


# ----------------------------------------------------------------------------
# Pallas kernel 1: pointwise (1x1) conv, channel-first == [Cout,Cin] @ [Cin,TS]
# Used for the q/k/v projections AND (full-depth) for the output projection.
# ----------------------------------------------------------------------------
def _pointwise_conv_kernel(x_ref, w_ref, b_ref, o_ref):
    x = x_ref[0].astype(jnp.float32)                       # [Cin, TS]  (TS on lanes)
    w = w_ref[...].astype(jnp.float32)                     # [Cout, Cin]
    y = jnp.dot(w, x, preferred_element_type=jnp.float32)  # [Cout, TS]  (MXU)
    y = y + b_ref[...].astype(jnp.float32)                 # + [Cout, 1]
    o_ref[0] = y.astype(o_ref.dtype)


def pointwise_conv_pallas(x_bcs, w, b):
    # x_bcs: [B, Cin, S] channel-first; w: [Cout, Cin]; b: [Cout]
    B, Cin, S = x_bcs.shape
    Cout = w.shape[0]
    itemsize = jnp.dtype(x_bcs.dtype).itemsize
    vmem_limit = _vmem_limit_bytes()
    bytes_per_lane = 2 * itemsize * (_round_up(Cin, 8) + _round_up(Cout, 8))
    TS = _pick_lane_tile(S, bytes_per_lane, vmem_limit // 2)
    Sp = _round_up(S, TS)
    if Sp != S:
        x_bcs = jnp.pad(x_bcs, ((0, 0), (0, 0), (0, Sp - S)))

    cost = pl.CostEstimate(
        flops=int(2 * B * Cout * Cin * Sp),
        transcendentals=0,
        bytes_accessed=int(itemsize * (B * Sp * (Cin + Cout) + Cout * Cin + Cout)),
    )

    out = pl.pallas_call(
        _pointwise_conv_kernel,
        out_shape=jax.ShapeDtypeStruct((B, Cout, Sp), x_bcs.dtype),
        grid_spec=pltpu.PrefetchScalarGridSpec(
            num_scalar_prefetch=0,
            grid=(B, Sp // TS),
            in_specs=[
                pl.BlockSpec((1, Cin, TS), lambda i, j: (i, 0, j)),
                pl.BlockSpec((Cout, Cin), lambda i, j: (0, 0)),
                pl.BlockSpec((Cout, 1), lambda i, j: (0, 0)),
            ],
            out_specs=pl.BlockSpec((1, Cout, TS), lambda i, j: (i, 0, j)),
        ),
        compiler_params=pltpu.CompilerParams(
            dimension_semantics=("parallel", "parallel"),
            vmem_limit_bytes=vmem_limit,
        ),
        cost_estimate=cost,
    )(x_bcs, w, b.reshape(Cout, 1))
    return out[:, :, :S] if Sp != S else out


# ----------------------------------------------------------------------------
# Pallas kernel 2: local attention over the K*K neighborhood.
# One (batch, head) per grid step; k/v blocks are the UN-unfolded padded maps
# and the K*K shifted views are formed in-kernel with static slices.
# ----------------------------------------------------------------------------
def _local_attn_kernel(q_ref, k_ref, v_ref, o_ref, *,
                       scale, kernel_size, stride, dilation, out_h, out_w):
    K = kernel_size
    q = q_ref[0].astype(jnp.float32) * scale               # [Dh, out_h, out_w]
    k = k_ref[0].astype(jnp.float32)                       # [Dh, Hp, Wp]
    v = v_ref[0].astype(jnp.float32)                       # [Dh, Hp, Wp]

    def shift(x, kh, kw):
        h0 = kh * dilation
        w0 = kw * dilation
        if stride == 1:
            return x[:, h0:h0 + out_h, w0:w0 + out_w]
        return x[:, h0:h0 + (out_h - 1) * stride + 1:stride,
                 w0:w0 + (out_w - 1) * stride + 1:stride]

    # logits[p] = sum_d q[d] * k_shift[p][d]  — one [out_h, out_w] tile per p,
    # never materializing a [P, Dh, out_h, out_w] temporary.
    logits = []
    for kh in range(K):
        for kw in range(K):
            logits.append(jnp.sum(q * shift(k, kh, kw), axis=0))
    logits = jnp.stack(logits, axis=0)                      # [P, out_h, out_w]

    m = jnp.max(logits, axis=0, keepdims=True)              # [1, out_h, out_w]
    e = jnp.exp(logits - m)                                 # [P, out_h, out_w]
    s = jnp.sum(e, axis=0, keepdims=True)                   # [1, out_h, out_w]
    attn = e / s                                            # exact divide (correctness)

    ctx = jnp.zeros(q.shape, jnp.float32)                   # [Dh, out_h, out_w]
    p = 0
    for kh in range(K):
        for kw in range(K):
            ctx = ctx + attn[p][None, :, :] * shift(v, kh, kw)
            p += 1

    o_ref[0] = ctx.astype(o_ref.dtype)


def local_attention_pallas(q_s, k_pad, v_pad, *, num_heads, kernel_size,
                           stride, dilation, scale):
    # q_s: [B, C, out_h, out_w]; k_pad/v_pad: [B, C, Hp, Wp]
    B, C, out_h, out_w = q_s.shape
    Hp, Wp = k_pad.shape[2], k_pad.shape[3]
    assert C % num_heads == 0
    Dh = C // num_heads
    P = kernel_size * kernel_size
    itemsize = jnp.dtype(q_s.dtype).itemsize

    kernel = functools.partial(
        _local_attn_kernel, scale=scale, kernel_size=kernel_size,
        stride=stride, dilation=dilation, out_h=out_h, out_w=out_w)

    cost = pl.CostEstimate(
        flops=int(4 * B * num_heads * P * Dh * out_h * out_w),
        transcendentals=int(B * num_heads * P * out_h * out_w),
        bytes_accessed=int(itemsize * (2 * B * C * out_h * out_w
                                       + 2 * B * C * Hp * Wp)),
    )

    return pl.pallas_call(
        kernel,
        out_shape=jax.ShapeDtypeStruct((B, C, out_h, out_w), q_s.dtype),
        grid_spec=pltpu.PrefetchScalarGridSpec(
            num_scalar_prefetch=0,
            grid=(B, num_heads),
            in_specs=[
                pl.BlockSpec((1, Dh, out_h, out_w), lambda b, h: (b, h, 0, 0)),
                pl.BlockSpec((1, Dh, Hp, Wp), lambda b, h: (b, h, 0, 0)),
                pl.BlockSpec((1, Dh, Hp, Wp), lambda b, h: (b, h, 0, 0)),
            ],
            out_specs=pl.BlockSpec((1, Dh, out_h, out_w), lambda b, h: (b, h, 0, 0)),
        ),
        compiler_params=pltpu.CompilerParams(
            dimension_semantics=("parallel", "parallel"),
            vmem_limit_bytes=_vmem_limit_bytes(),
        ),
        cost_estimate=cost,
    )(q_s, k_pad, v_pad)


# ----------------------------------------------------------------------------
# Full forward pass (NCHW in / NCHW out) — Pallas path
# ----------------------------------------------------------------------------
def multi_head_local_attention_2d(
    params, queries, keys, values, *,
    kernel_size, stride, padding, dilation, num_heads,
):
    B, Cin, H, W = queries.shape
    C = params["wq"].shape[0]              # weights are [Cout, Cin] (PyTorch conv)
    assert C % num_heads == 0
    K = kernel_size
    out_h, out_w = conv_output_size((H, W), K, stride, padding, dilation)

    def proj(x, w, b):
        y = pointwise_conv_pallas(x.reshape(B, Cin, H * W), w, b)
        return y.reshape(B, C, H, W)

    q_p = proj(queries, params["wq"], params["bq"])
    k_p = proj(keys, params["wk"], params["bk"])
    v_p = proj(values, params["wv"], params["bv"])

    # query unfold: kernel_size=1, stride=stride (strided spatial subsample)
    q_s = q_p[:, :, ::stride, ::stride]
    assert q_s.shape[2:] == (out_h, out_w), \
        "query grid and key/value unfold grid must match"

    # zero padding matches nn.Unfold's implicit zero padding of k/v
    k_pad = jnp.pad(k_p, ((0, 0), (0, 0), (padding, padding), (padding, padding)))
    v_pad = jnp.pad(v_p, ((0, 0), (0, 0), (padding, padding), (padding, padding)))

    scale = float(1.0 / np.sqrt(C))        # module scales by 1/sqrt(out_channels)
    ctx = local_attention_pallas(
        q_s, k_pad, v_pad, num_heads=num_heads, kernel_size=K,
        stride=stride, dilation=dilation, scale=scale)      # [B, C, out_h, out_w]

    # output projection: single full-depth [C, C] @ [C, TS] MXU matmul per tile
    o = pointwise_conv_pallas(ctx.reshape(B, C, out_h * out_w),
                              params["wo"], params["bo"])
    return o.reshape(B, C, out_h, out_w)


# ----------------------------------------------------------------------------
# Pure-JAX reference (explicit unfold, mirrors the PyTorch module exactly)
# ----------------------------------------------------------------------------
def reference_forward(params, queries, keys, values, *,
                      kernel_size, stride, padding, dilation, num_heads):
    B, Cin, H, W = queries.shape
    C = params["wq"].shape[0]
    Dh = C // num_heads
    K = kernel_size
    out_h, out_w = conv_output_size((H, W), K, stride, padding, dilation)

    def proj(x, w, b):
        return jnp.einsum("oc,bchw->bohw", w, x) + b[None, :, None, None]

    q_p = proj(queries, params["wq"], params["bq"])
    k_p = proj(keys, params["wk"], params["bk"])
    v_p = proj(values, params["wv"], params["bv"])

    q_h = q_p[:, :, ::stride, ::stride].reshape(B, num_heads, Dh, out_h * out_w)

    def unfold(x):
        xp = jnp.pad(x, ((0, 0), (0, 0), (padding, padding), (padding, padding)))
        cols = []
        for kh in range(K):
            for kw in range(K):
                h0, w0 = kh * dilation, kw * dilation
                cols.append(xp[:, :, h0:h0 + (out_h - 1) * stride + 1:stride,
                               w0:w0 + (out_w - 1) * stride + 1:stride])
        p = jnp.stack(cols, axis=2)                 # [B, C, P, out_h, out_w]
        return p.reshape(B, num_heads, Dh, K * K, out_h * out_w)

    k_h = unfold(k_p)
    v_h = unfold(v_p)

    scale = 1.0 / np.sqrt(C)
    logits = jnp.einsum("bhdl,bhdpl->bhpl", q_h, k_h) * scale
    attn = jax.nn.softmax(logits, axis=2)
    ctx = jnp.einsum("bhdpl,bhpl->bhdl", v_h, attn).reshape(B, C, out_h * out_w)
    o = jnp.einsum("oc,bcl->bol", params["wo"], ctx) + params["bo"][None, :, None]
    return o.reshape(B, C, out_h, out_w)


if __name__ == "__main__":
    B, Cin, H, W = 2, 4, 16, 16
    C_out, num_heads = 8, 2
    K, stride, padding, dilation = 3, 1, 1, 1

    key = jax.random.PRNGKey(0)
    ks = jax.random.split(key, 11)
    queries = jax.random.normal(ks[0], (B, Cin, H, W), jnp.float32)
    keys_in = jax.random.normal(ks[1], (B, Cin, H, W), jnp.float32)
    values = jax.random.normal(ks[2], (B, Cin, H, W), jnp.float32)

    def init_linear(kw, kb, cin, cout):
        w = jax.random.normal(kw, (cout, cin), jnp.float32) / np.sqrt(cin)
        b = jax.random.normal(kb, (cout,), jnp.float32) * 0.1
        return w, b

    wq, bq = init_linear(ks[3], ks[4], Cin, C_out)
    wk, bk = init_linear(ks[5], ks[6], Cin, C_out)
    wv, bv = init_linear(ks[7], ks[8], Cin, C_out)
    wo, bo = init_linear(ks[9], ks[10], C_out, C_out)
    params = dict(wq=wq, bq=bq, wk=wk, bk=bk, wv=wv, bv=bv, wo=wo, bo=bo)

    fwd = functools.partial(
        multi_head_local_attention_2d,
        kernel_size=K, stride=stride, padding=padding,
        dilation=dilation, num_heads=num_heads,
    )

    out = jax.jit(fwd)(params, queries, keys_in, values)
    out = jax.block_until_ready(out)

    ref = reference_forward(params, queries, keys_in, values,
                            kernel_size=K, stride=stride, padding=padding,
                            dilation=dilation, num_heads=num_heads)

    expected_hw = conv_output_size((H, W), K, stride, padding, dilation)
    assert out.shape == (B, C_out) + expected_hw
    np.testing.assert_allclose(np.asarray(out), np.asarray(ref), rtol=2e-3, atol=2e-3)
    print("KERNEL_OK")
</pallas_src>

<mosaic_0001>
module attributes {stable_mosaic.version = 11 : i64} {
  func.func @_pointwise_conv_kernel(%arg0: i32, %arg1: i32, %arg2: memref<1x4x256xf32, #tpu.memory_space<vmem>>, %arg3: memref<8x4xf32, #tpu.memory_space<vmem>>, %arg4: memref<8x1xf32, #tpu.memory_space<vmem>>, %arg5: memref<1x8x256xf32, #tpu.memory_space<vmem>>) attributes {dimension_semantics = [#tpu.dimension_semantics<parallel>, #tpu.dimension_semantics<parallel>], iteration_bounds = array<i64: 2, 1>, scalar_prefetch = 0 : i64, scratch_operands = 0 : i64, tpu.core_type = #tpu.core_type<tc>, window_params = [{transform_indices = @transform_0, window_bounds = array<i64: 1, 4, 256>}, {pipeline_mode = #tpu.pipeline_mode<synchronous>, transform_indices = @transform_1, window_bounds = array<i64: 8, 4>}, {pipeline_mode = #tpu.pipeline_mode<synchronous>, transform_indices = @transform_2, window_bounds = array<i64: 8, 1>}, {transform_indices = @transform_3, window_bounds = array<i64: 1, 8, 256>}]} {
    %c0 = arith.constant 0 : index
    %c0_0 = arith.constant 0 : index
    %c0_1 = arith.constant 0 : index
    %0 = vector.load %arg2[%c0, %c0_0, %c0_1] : memref<1x4x256xf32, #tpu.memory_space<vmem>>, vector<1x4x256xf32>
    %1 = vector.shape_cast %0 : vector<1x4x256xf32> to vector<4x256xf32>
    %c0_2 = arith.constant 0 : index
    %c0_3 = arith.constant 0 : index
    %2 = vector.load %arg3[%c0_2, %c0_3] : memref<8x4xf32, #tpu.memory_space<vmem>>, vector<8x4xf32>
    %cst = arith.constant dense<0.000000e+00> : vector<8x256xf32>
    %3 = tpu.matmul %2, %1, %cst {dimension_numbers = #tpu.dot_dimension_numbers<[1], [0], [0], [1], [0, 0, 1, 1], [], []>} : vector<8x4xf32>, vector<4x256xf32>, vector<8x256xf32> -> vector<8x256xf32>
    %c0_4 = arith.constant 0 : index
    %c0_5 = arith.constant 0 : index
    %4 = vector.load %arg4[%c0_4, %c0_5] : memref<8x1xf32, #tpu.memory_space<vmem>>, vector<8x1xf32>
    %5 = vector.broadcast %4 : vector<8x1xf32> to vector<8x256xf32>
    %6 = arith.addf %3, %5 : vector<8x256xf32>
    %c0_6 = arith.constant 0 : index
    %c0_7 = arith.constant 0 : index
    %c0_8 = arith.constant 0 : index
    %7 = vector.load %arg5[%c0_6, %c0_7, %c0_8] : memref<1x8x256xf32, #tpu.memory_space<vmem>>, vector<1x8x256xf32>
    %8 = vector.shape_cast %7 : vector<1x8x256xf32> to vector<8x256xf32>
    %9 = vector.shape_cast %6 : vector<8x256xf32> to vector<1x8x256xf32>
    tpu.vector_store %arg5[%c0_6, %c0_7, %c0_8], %9 {strides = array<i32>} : memref<1x8x256xf32, #tpu.memory_space<vmem>>, vector<1x8x256xf32>,
    return
  }
  func.func @transform_0(%arg0: i32, %arg1: i32) -> (i32, i32, i32) {
    %c0_i32 = arith.constant 0 : i32
    %c0_i32_0 = arith.constant 0 : i32
    return %arg0, %c0_i32, %arg1 : i32, i32, i32
  }
  func.func @transform_1(%arg0: i32, %arg1: i32) -> (i32, i32) {
    %c0_i32 = arith.constant 0 : i32
    %c0_i32_0 = arith.constant 0 : i32
    %c0_i32_1 = arith.constant 0 : i32
    return %c0_i32, %c0_i32_0 : i32, i32
  }
  func.func @transform_2(%arg0: i32, %arg1: i32) -> (i32, i32) {
    %c0_i32 = arith.constant 0 : i32
    %c0_i32_0 = arith.constant 0 : i32
    %c0_i32_1 = arith.constant 0 : i32
    return %c0_i32, %c0_i32_0 : i32, i32
  }
  func.func @transform_3(%arg0: i32, %arg1: i32) -> (i32, i32, i32) {
    %c0_i32 = arith.constant 0 : i32
    %c0_i32_0 = arith.constant 0 : i32
    return %arg0, %c0_i32, %arg1 : i32, i32, i32
  }
}

module attributes {stable_mosaic.version = 11 : i64} {
  func.func @_local_attn_kernel(%arg0: i32, %arg1: i32, %arg2: memref<1x4x16x16xf32, #tpu.memory_space<vmem>>, %arg3: memref<1x4x18x18xf32, #tpu.memory_space<vmem>>, %arg4: memref<1x4x18x18xf32, #tpu.memory_space<vmem>>, %arg5: memref<1x4x16x16xf32, #tpu.memory_space<vmem>>) attributes {dimension_semantics = [#tpu.dimension_semantics<parallel>, #tpu.dimension_semantics<parallel>], iteration_bounds = array<i64: 2, 2>, scalar_prefetch = 0 : i64, scratch_operands = 0 : i64, tpu.core_type = #tpu.core_type<tc>, window_params = [{transform_indices = @transform_0, window_bounds = array<i64: 1, 4, 16, 16>}, {transform_indices = @transform_1, window_bounds = array<i64: 1, 4, 18, 18>}, {transform_indices = @transform_2, window_bounds = array<i64: 1, 4, 18, 18>}, {transform_indices = @transform_3, window_bounds = array<i64: 1, 4, 16, 16>}]} {
    %c0 = arith.constant 0 : index
    %c0_0 = arith.constant 0 : index
    %c0_1 = arith.constant 0 : index
    %c0_2 = arith.constant 0 : index
    %0 = vector.load %arg2[%c0, %c0_0, %c0_1, %c0_2] : memref<1x4x16x16xf32, #tpu.memory_space<vmem>>, vector<1x4x16x16xf32>
    %1 = vector.shape_cast %0 : vector<1x4x16x16xf32> to vector<4x16x16xf32>
    %cst = arith.constant 0.353553385 : f32
    %2 = vector.broadcast %cst : f32 to vector<4x16x16xf32>
    %3 = arith.mulf %1, %2 : vector<4x16x16xf32>
    %c0_3 = arith.constant 0 : index
    %c0_4 = arith.constant 0 : index
    %c0_5 = arith.constant 0 : index
    %c0_6 = arith.constant 0 : index
    %4 = vector.load %arg3[%c0_3, %c0_4, %c0_5, %c0_6] : memref<1x4x18x18xf32, #tpu.memory_space<vmem>>, vector<1x4x18x18xf32>
    %5 = vector.shape_cast %4 : vector<1x4x18x18xf32> to vector<4x18x18xf32>
    %c0_7 = arith.constant 0 : index
    %c0_8 = arith.constant 0 : index
    %c0_9 = arith.constant 0 : index
    %c0_10 = arith.constant 0 : index
    %6 = vector.load %arg4[%c0_7, %c0_8, %c0_9, %c0_10] : memref<1x4x18x18xf32, #tpu.memory_space<vmem>>, vector<1x4x18x18xf32>
    %7 = vector.shape_cast %6 : vector<1x4x18x18xf32> to vector<4x18x18xf32>
    %8 = vector.extract_strided_slice %5 {offsets = [0, 0, 0], sizes = [4, 16, 16], strides = [1, 1, 1]} : vector<4x18x18xf32> to vector<4x16x16xf32>
    %9 = arith.mulf %3, %8 : vector<4x16x16xf32>
    %cst_11 = arith.constant dense<0.000000e+00> : vector<16x16xf32>
    %10 = vector.multi_reduction <add>, %9, %cst_11 [0] : vector<4x16x16xf32> to vector<16x16xf32>
    %11 = vector.extract_strided_slice %5 {offsets = [0, 0, 1], sizes = [4, 16, 16], strides = [1, 1, 1]} : vector<4x18x18xf32> to vector<4x16x16xf32>
    %12 = arith.mulf %3, %11 : vector<4x16x16xf32>
    %cst_12 = arith.constant dense<0.000000e+00> : vector<16x16xf32>
    %13 = vector.multi_reduction <add>, %12, %cst_12 [0] : vector<4x16x16xf32> to vector<16x16xf32>
    %14 = vector.extract_strided_slice %5 {offsets = [0, 0, 2], sizes = [4, 16, 16], strides = [1, 1, 1]} : vector<4x18x18xf32> to vector<4x16x16xf32>
    %15 = arith.mulf %3, %14 : vector<4x16x16xf32>
    %cst_13 = arith.constant dense<0.000000e+00> : vector<16x16xf32>
    %16 = vector.multi_reduction <add>, %15, %cst_13 [0] : vector<4x16x16xf32> to vector<16x16xf32>
    %17 = vector.extract_strided_slice %5 {offsets = [0, 1, 0], sizes = [4, 16, 16], strides = [1, 1, 1]} : vector<4x18x18xf32> to vector<4x16x16xf32>
    %18 = arith.mulf %3, %17 : vector<4x16x16xf32>
    %cst_14 = arith.constant dense<0.000000e+00> : vector<16x16xf32>
    %19 = vector.multi_reduction <add>, %18, %cst_14 [0] : vector<4x16x16xf32> to vector<16x16xf32>
    %20 = vector.extract_strided_slice %5 {offsets = [0, 1, 1], sizes = [4, 16, 16], strides = [1, 1, 1]} : vector<4x18x18xf32> to vector<4x16x16xf32>
    %21 = arith.mulf %3, %20 : vector<4x16x16xf32>
    %cst_15 = arith.constant dense<0.000000e+00> : vector<16x16xf32>
    %22 = vector.multi_reduction <add>, %21, %cst_15 [0] : vector<4x16x16xf32> to vector<16x16xf32>
    %23 = vector.extract_strided_slice %5 {offsets = [0, 1, 2], sizes = [4, 16, 16], strides = [1, 1, 1]} : vector<4x18x18xf32> to vector<4x16x16xf32>
    %24 = arith.mulf %3, %23 : vector<4x16x16xf32>
    %cst_16 = arith.constant dense<0.000000e+00> : vector<16x16xf32>
    %25 = vector.multi_reduction <add>, %24, %cst_16 [0] : vector<4x16x16xf32> to vector<16x16xf32>
    %26 = vector.extract_strided_slice %5 {offsets = [0, 2, 0], sizes = [4, 16, 16], strides = [1, 1, 1]} : vector<4x18x18xf32> to vector<4x16x16xf32>
    %27 = arith.mulf %3, %26 : vector<4x16x16xf32>
    %cst_17 = arith.constant dense<0.000000e+00> : vector<16x16xf32>
    %28 = vector.multi_reduction <add>, %27, %cst_17 [0] : vector<4x16x16xf32> to vector<16x16xf32>
    %29 = vector.extract_strided_slice %5 {offsets = [0, 2, 1], sizes = [4, 16, 16], strides = [1, 1, 1]} : vector<4x18x18xf32> to vector<4x16x16xf32>
    %30 = arith.mulf %3, %29 : vector<4x16x16xf32>
    %cst_18 = arith.constant dense<0.000000e+00> : vector<16x16xf32>
    %31 = vector.multi_reduction <add>, %30, %cst_18 [0] : vector<4x16x16xf32> to vector<16x16xf32>
    %32 = vector.extract_strided_slice %5 {offsets = [0, 2, 2], sizes = [4, 16, 16], strides = [1, 1, 1]} : vector<4x18x18xf32> to vector<4x16x16xf32>
    %33 = arith.mulf %3, %32 : vector<4x16x16xf32>
    %cst_19 = arith.constant dense<0.000000e+00> : vector<16x16xf32>
    %34 = vector.multi_reduction <add>, %33, %cst_19 [0] : vector<4x16x16xf32> to vector<16x16xf32>
    %35 = vector.shape_cast %10 : vector<16x16xf32> to vector<1x16x16xf32>
    %36 = vector.shape_cast %13 : vector<16x16xf32> to vector<1x16x16xf32>
    %37 = vector.shape_cast %16 : vector<16x16xf32> to vector<1x16x16xf32>
    %38 = vector.shape_cast %19 : vector<16x16xf32> to vector<1x16x16xf32>
    %39 = vector.shape_cast %22 : vector<16x16xf32> to vector<1x16x16xf32>
    %40 = vector.shape_cast %25 : vector<16x16xf32> to vector<1x16x16xf32>
    %41 = vector.shape_cast %28 : vector<16x16xf32> to vector<1x16x16xf32>
    %42 = vector.shape_cast %31 : vector<16x16xf32> to vector<1x16x16xf32>
    %43 = vector.shape_cast %34 : vector<16x16xf32> to vector<1x16x16xf32>
    %44 = tpu.concatenate %35, %36, %37, %38, %39, %40, %41, %42, %43 in 0 : vector<1x16x16xf32>, vector<1x16x16xf32>, vector<1x16x16xf32>, vector<1x16x16xf32>, vector<1x16x16xf32>, vector<1x16x16xf32>, vector<1x16x16xf32>, vector<1x16x16xf32>, vector<1x16x16xf32> -> vector<9x16x16xf32>
    %cst_20 = arith.constant dense<0xFF800000> : vector<16x16xf32>
    %45 = vector.multi_reduction <maximumf>, %44, %cst_20 [0] : vector<9x16x16xf32> to vector<16x16xf32>
    %46 = vector.shape_cast %45 : vector<16x16xf32> to vector<1x16x16xf32>
    %47 = vector.broadcast %46 : vector<1x16x16xf32> to vector<9x16x16xf32>
    %48 = arith.subf %44, %47 : vector<9x16x16xf32>
    %49 = math.exp %48 : vector<9x16x16xf32>
    %cst_21 = arith.constant dense<0.000000e+00> : vector<16x16xf32>
    %50 = vector.multi_reduction <add>, %49, %cst_21 [0] : vector<9x16x16xf32> to vector<16x16xf32>
    %51 = vector.shape_cast %50 : vector<16x16xf32> to vector<1x16x16xf32>
    %52 = vector.broadcast %51 : vector<1x16x16xf32> to vector<9x16x16xf32>
    %53 = arith.divf %49, %52 : vector<9x16x16xf32>
    %cst_22 = arith.constant 0.000000e+00 : f32
    %54 = vector.broadcast %cst_22 : f32 to vector<4x16x16xf32>
    %55 = vector.extract_strided_slice %53 {offsets = [0, 0, 0], sizes = [1, 16, 16], strides = [1, 1, 1]} : vector<9x16x16xf32> to vector<1x16x16xf32>
    %56 = vector.shape_cast %55 : vector<1x16x16xf32> to vector<16x16xf32>
    %57 = vector.shape_cast %56 : vector<16x16xf32> to vector<1x16x16xf32>
    %58 = vector.extract_strided_slice %7 {offsets = [0, 0, 0], sizes = [4, 16, 16], strides = [1, 1, 1]} : vector<4x18x18xf32> to vector<4x16x16xf32>
    %59 = vector.broadcast %57 : vector<1x16x16xf32> to vector<4x16x16xf32>
    %60 = arith.mulf %59, %58 : vector<4x16x16xf32>
    %61 = arith.addf %54, %60 : vector<4x16x16xf32>
    %62 = vector.extract_strided_slice %53 {offsets = [1, 0, 0], sizes = [1, 16, 16], strides = [1, 1, 1]} : vector<9x16x16xf32> to vector<1x16x16xf32>
    %63 = vector.shape_cast %62 : vector<1x16x16xf32> to vector<16x16xf32>
    %64 = vector.shape_cast %63 : vector<16x16xf32> to vector<1x16x16xf32>
    %65 = vector.extract_strided_slice %7 {offsets = [0, 0, 1], sizes = [4, 16, 16], strides = [1, 1, 1]} : vector<4x18x18xf32> to vector<4x16x16xf32>
    %66 = vector.broadcast %64 : vector<1x16x16xf32> to vector<4x16x16xf32>
    %67 = arith.mulf %66, %65 : vector<4x16x16xf32>
    %68 = arith.addf %61, %67 : vector<4x16x16xf32>
    %69 = vector.extract_strided_slice %53 {offsets = [2, 0, 0], sizes = [1, 16, 16], strides = [1, 1, 1]} : vector<9x16x16xf32> to vector<1x16x16xf32>
    %70 = vector.shape_cast %69 : vector<1x16x16xf32> to vector<16x16xf32>
    %71 = vector.shape_cast %70 : vector<16x16xf32> to vector<1x16x16xf32>
    %72 = vector.extract_strided_slice %7 {offsets = [0, 0, 2], sizes = [4, 16, 16], strides = [1, 1, 1]} : vector<4x18x18xf32> to vector<4x16x16xf32>
    %73 = vector.broadcast %71 : vector<1x16x16xf32> to vector<4x16x16xf32>
    %74 = arith.mulf %73, %72 : vector<4x16x16xf32>
    %75 = arith.addf %68, %74 : vector<4x16x16xf32>
    %76 = vector.extract_strided_slice %53 {offsets = [3, 0, 0], sizes = [1, 16, 16], strides = [1, 1, 1]} : vector<9x16x16xf32> to vector<1x16x16xf32>
    %77 = vector.shape_cast %76 : vector<1x16x16xf32> to vector<16x16xf32>
    %78 = vector.shape_cast %77 : vector<16x16xf32> to vector<1x16x16xf32>
    %79 = vector.extract_strided_slice %7 {offsets = [0, 1, 0], sizes = [4, 16, 16], strides = [1, 1, 1]} : vector<4x18x18xf32> to vector<4x16x16xf32>
    %80 = vector.broadcast %78 : vector<1x16x16xf32> to vector<4x16x16xf32>
    %81 = arith.mulf %80, %79 : vector<4x16x16xf32>
    %82 = arith.addf %75, %81 : vector<4x16x16xf32>
    %83 = vector.extract_strided_slice %53 {offsets = [4, 0, 0], sizes = [1, 16, 16], strides = [1, 1, 1]} : vector<9x16x16xf32> to vector<1x16x16xf32>
    %84 = vector.shape_cast %83 : vector<1x16x16xf32> to vector<16x16xf32>
    %85 = vector.shape_cast %84 : vector<16x16xf32> to vector<1x16x16xf32>
    %86 = vector.extract_strided_slice %7 {offsets = [0, 1, 1], sizes = [4, 16, 16], strides = [1, 1, 1]} : vector<4x18x18xf32> to vector<4x16x16xf32>
    %87 = vector.broadcast %85 : vector<1x16x16xf32> to vector<4x16x16xf32>
    %88 = arith.mulf %87, %86 : vector<4x16x16xf32>
    %89 = arith.addf %82, %88 : vector<4x16x16xf32>
    %90 = vector.extract_strided_slice %53 {offsets = [5, 0, 0], sizes = [1, 16, 16], strides = [1, 1, 1]} : vector<9x16x16xf32> to vector<1x16x16xf32>
    %91 = vector.shape_cast %90 : vector<1x16x16xf32> to vector<16x16xf32>
    %92 = vector.shape_cast %91 : vector<16x16xf32> to vector<1x16x16xf32>
    %93 = vector.extract_strided_slice %7 {offsets = [0, 1, 2], sizes = [4, 16, 16], strides = [1, 1, 1]} : vector<4x18x18xf32> to vector<4x16x16xf32>
    %94 = vector.broadcast %92 : vector<1x16x16xf32> to vector<4x16x16xf32>
    %95 = arith.mulf %94, %93 : vector<4x16x16xf32>
    %96 = arith.addf %89, %95 : vector<4x16x16xf32>
    %97 = vector.extract_strided_slice %53 {offsets = [6, 0, 0], sizes = [1, 16, 16], strides = [1, 1, 1]} : vector<9x16x16xf32> to vector<1x16x16xf32>
    %98 = vector.shape_cast %97 : vector<1x16x16xf32> to vector<16x16xf32>
    %99 = vector.shape_cast %98 : vector<16x16xf32> to vector<1x16x16xf32>
    %100 = vector.extract_strided_slice %7 {offsets = [0, 2, 0], sizes = [4, 16, 16], strides = [1, 1, 1]} : vector<4x18x18xf32> to vector<4x16x16xf32>
    %101 = vector.broadcast %99 : vector<1x16x16xf32> to vector<4x16x16xf32>
    %102 = arith.mulf %101, %100 : vector<4x16x16xf32>
    %103 = arith.addf %96, %102 : vector<4x16x16xf32>
    %104 = vector.extract_strided_slice %53 {offsets = [7, 0, 0], sizes = [1, 16, 16], strides = [1, 1, 1]} : vector<9x16x16xf32> to vector<1x16x16xf32>
    %105 = vector.shape_cast %104 : vector<1x16x16xf32> to vector<16x16xf32>
    %106 = vector.shape_cast %105 : vector<16x16xf32> to vector<1x16x16xf32>
    %107 = vector.extract_strided_slice %7 {offsets = [0, 2, 1], sizes = [4, 16, 16], strides = [1, 1, 1]} : vector<4x18x18xf32> to vector<4x16x16xf32>
    %108 = vector.broadcast %106 : vector<1x16x16xf32> to vector<4x16x16xf32>
    %109 = arith.mulf %108, %107 : vector<4x16x16xf32>
    %110 = arith.addf %103, %109 : vector<4x16x16xf32>
    %111 = vector.extract_strided_slice %53 {offsets = [8, 0, 0], sizes = [1, 16, 16], strides = [1, 1, 1]} : vector<9x16x16xf32> to vector<1x16x16xf32>
    %112 = vector.shape_cast %111 : vector<1x16x16xf32> to vector<16x16xf32>
    %113 = vector.shape_cast %112 : vector<16x16xf32> to vector<1x16x16xf32>
    %114 = vector.extract_strided_slice %7 {offsets = [0, 2, 2], sizes = [4, 16, 16], strides = [1, 1, 1]} : vector<4x18x18xf32> to vector<4x16x16xf32>
    %115 = vector.broadcast %113 : vector<1x16x16xf32> to vector<4x16x16xf32>
    %116 = arith.mulf %115, %114 : vector<4x16x16xf32>
    %117 = arith.addf %110, %116 : vector<4x16x16xf32>
    %c0_23 = arith.constant 0 : index
    %c0_24 = arith.constant 0 : index
    %c0_25 = arith.constant 0 : index
    %c0_26 = arith.constant 0 : index
    %118 = vector.load %arg5[%c0_23, %c0_24, %c0_25, %c0_26] : memref<1x4x16x16xf32, #tpu.memory_space<vmem>>, vector<1x4x16x16xf32>
    %119 = vector.shape_cast %118 : vector<1x4x16x16xf32> to vector<4x16x16xf32>
    %120 = vector.shape_cast %117 : vector<4x16x16xf32> to vector<1x4x16x16xf32>
    tpu.vector_store %arg5[%c0_23, %c0_24, %c0_25, %c0_26], %120 {strides = array<i32>} : memref<1x4x16x16xf32, #tpu.memory_space<vmem>>, vector<1x4x16x16xf32>,
    return
  }
  func.func @transform_0(%arg0: i32, %arg1: i32) -> (i32, i32, i32, i32) {
    %c0_i32 = arith.constant 0 : i32
    %c0_i32_0 = arith.constant 0 : i32
    %c0_i32_1 = arith.constant 0 : i32
    return %arg0, %arg1, %c0_i32, %c0_i32_0 : i32, i32, i32, i32
  }
  func.func @transform_1(%arg0: i32, %arg1: i32) -> (i32, i32, i32, i32) {
    %c0_i32 = arith.constant 0 : i32
    %c0_i32_0 = arith.constant 0 : i32
    %c0_i32_1 = arith.constant 0 : i32
    return %arg0, %arg1, %c0_i32, %c0_i32_0 : i32, i32, i32, i32
  }
  func.func @transform_2(%arg0: i32, %arg1: i32) -> (i32, i32, i32, i32) {
    %c0_i32 = arith.constant 0 : i32
    %c0_i32_0 = arith.constant 0 : i32
    %c0_i32_1 = arith.constant 0 : i32
    return %arg0, %arg1, %c0_i32, %c0_i32_0 : i32, i32, i32, i32
  }
  func.func @transform_3(%arg0: i32, %arg1: i32) -> (i32, i32, i32, i32) {
    %c0_i32 = arith.constant 0 : i32
    %c0_i32_0 = arith.constant 0 : i32
    %c0_i32_1 = arith.constant 0 : i32
    return %arg0, %arg1, %c0_i32, %c0_i32_0 : i32, i32, i32, i32
  }
}

module attributes {stable_mosaic.version = 11 : i64} {
  func.func @_pointwise_conv_kernel(%arg0: i32, %arg1: i32, %arg2: memref<1x8x256xf32, #tpu.memory_space<vmem>>, %arg3: memref<8x8xf32, #tpu.memory_space<vmem>>, %arg4: memref<8x1xf32, #tpu.memory_space<vmem>>, %arg5: memref<1x8x256xf32, #tpu.memory_space<vmem>>) attributes {dimension_semantics = [#tpu.dimension_semantics<parallel>, #tpu.dimension_semantics<parallel>], iteration_bounds = array<i64: 2, 1>, scalar_prefetch = 0 : i64, scratch_operands = 0 : i64, tpu.core_type = #tpu.core_type<tc>, window_params = [{transform_indices = @transform_0, window_bounds = array<i64: 1, 8, 256>}, {pipeline_mode = #tpu.pipeline_mode<synchronous>, transform_indices = @transform_1, window_bounds = array<i64: 8, 8>}, {pipeline_mode = #tpu.pipeline_mode<synchronous>, transform_indices = @transform_2, window_bounds = array<i64: 8, 1>}, {transform_indices = @transform_3, window_bounds = array<i64: 1, 8, 256>}]} {
    %c0 = arith.constant 0 : index
    %c0_0 = arith.constant 0 : index
    %c0_1 = arith.constant 0 : index
    %0 = vector.load %arg2[%c0, %c0_0, %c0_1] : memref<1x8x256xf32, #tpu.memory_space<vmem>>, vector<1x8x256xf32>
    %1 = vector.shape_cast %0 : vector<1x8x256xf32> to vector<8x256xf32>
    %c0_2 = arith.constant 0 : index
    %c0_3 = arith.constant 0 : index
    %2 = vector.load %arg3[%c0_2, %c0_3] : memref<8x8xf32, #tpu.memory_space<vmem>>, vector<8x8xf32>
    %cst = arith.constant dense<0.000000e+00> : vector<8x256xf32>
    %3 = tpu.matmul %2, %1, %cst {dimension_numbers = #tpu.dot_dimension_numbers<[1], [0], [0], [1], [0, 0, 1, 1], [], []>} : vector<8x8xf32>, vector<8x256xf32>, vector<8x256xf32> -> vector<8x256xf32>
    %c0_4 = arith.constant 0 : index
    %c0_5 = arith.constant 0 : index
    %4 = vector.load %arg4[%c0_4, %c0_5] : memref<8x1xf32, #tpu.memory_space<vmem>>, vector<8x1xf32>
    %5 = vector.broadcast %4 : vector<8x1xf32> to vector<8x256xf32>
    %6 = arith.addf %3, %5 : vector<8x256xf32>
    %c0_6 = arith.constant 0 : index
    %c0_7 = arith.constant 0 : index
    %c0_8 = arith.constant 0 : index
    %7 = vector.load %arg5[%c0_6, %c0_7, %c0_8] : memref<1x8x256xf32, #tpu.memory_space<vmem>>, vector<1x8x256xf32>
    %8 = vector.shape_cast %7 : vector<1x8x256xf32> to vector<8x256xf32>
    %9 = vector.shape_cast %6 : vector<8x256xf32> to vector<1x8x256xf32>
    tpu.vector_store %arg5[%c0_6, %c0_7, %c0_8], %9 {strides = array<i32>} : memref<1x8x256xf32, #tpu.memory_space<vmem>>, vector<1x8x256xf32>,
    return
  }
  func.func @transform_0(%arg0: i32, %arg1: i32) -> (i32, i32, i32) {
    %c0_i32 = arith.constant 0 : i32
    %c0_i32_0 = arith.constant 0 : i32
    return %arg0, %c0_i32, %arg1 : i32, i32, i32
  }
  func.func @transform_1(%arg0: i32, %arg1: i32) -> (i32, i32) {
    %c0_i32 = arith.constant 0 : i32
    %c0_i32_0 = arith.constant 0 : i32
    %c0_i32_1 = arith.constant 0 : i32
    return %c0_i32, %c0_i32_0 : i32, i32
  }
  func.func @transform_2(%arg0: i32, %arg1: i32) -> (i32, i32) {
    %c0_i32 = arith.constant 0 : i32
    %c0_i32_0 = arith.constant 0 : i32
    %c0_i32_1 = arith.constant 0 : i32
    return %c0_i32, %c0_i32_0 : i32, i32
  }
  func.func @transform_3(%arg0: i32, %arg1: i32) -> (i32, i32, i32) {
    %c0_i32 = arith.constant 0 : i32
    %c0_i32_0 = arith.constant 0 : i32
    return %arg0, %c0_i32, %arg1 : i32, i32, i32
  }
}

</mosaic_0001>

<bundles_post_ra>
// kernel: multi_head_local_attention_2d.6
= control target key start
LH: loop header
LB: loop body
LE: loop exit
PB: predicated region body
PF: predicated region fallthrough
CT: control target
= control target key end

     0   :  { %s479_s12 = smov 0   ;;  %s481_s13 = smov 0   ;;  %s518_s0 = inlined_call_operand.vmem [shape: f32[2,4,256], index: 0, kind: input, shape index: {}]   ;;  %s519_s1 = inlined_call_operand.vmem [shape: f32[8,4], index: 1, kind: input, shape index: {}]   ;;  %s520_s2 = inlined_call_operand.vmem [shape: f32[8,1], index: 2, kind: input, shape index: {}]   ;;  %s521_s3 = inlined_call_operand.vmem [shape: f32[2,8,256], index: 3, kind: output, shape index: {}]  }
   0x1   :  { %s483_s14 = smov 0  }
   0x2 LB: > { %s25_s15 = sadd.s32 1, %s451_s13  ;;  %p393_p0 = scmp.ge.s32.totalorder %s455_s14, 1  ;;  %s455_s14 = sphi %s483_s14, %s13_s14   ;;  %s451_s13 = sphi %s481_s13, %s523_s13   ;;  %s447_s12 = sphi %s479_s12, %s522_s12  }
   0x3   : > { %p27_p1 = scmp.ge.s32.totalorder %s25_s15, 2  ;;  %p158_p2 = scmp.lt.s32.totalorder %s455_s14, 3 }
   0x5   : > { %s525_s15 = smov (%p27_p1, %s25_s15), 0  ;;  %p159_p3 = pnand %p393_p0, %p158_p2 }
   0x6   : > { %p191_p4 = scmp.lt.s32.totalorder (!%p159_p3), %s447_s12, 1 }
   0x7   : > { %162 = sbr.rel (%p159_p3) target bundleno = 218 (0xda), region = 32 }
   0xc   : > { %v457_v0 = vmov 0.0   ;;  %v458_v1 = vmov 0   ;;  %v212_v2 = vld [vmem:[%s520_s2] sm:$0xff]  ;;  %s527_s12 = smov (!%p191_p4, %s447_s12), 1  ;;  %vm224_vm0 = vcmask 1043456   ;;  %vm220_vm1 = vcmask 31744  }
   0xd   : > { %293 = vmatprep.mubr.f32.mxu0 %v457_v0  ;;  %431 = vset.pattern.permute.xlu0 %v458_v1  ;;  %s403_s18 = sshll.u32 %s527_s12, 3  ;;  %v211_v5 = vld [vmem:[%s519_s1] sm:$0xff]  ;;  %s404_s24 = sshll.u32 %s527_s12, 4 }
   0xe   : > { %215 = vperm.xlu0 %431, %v212_v2   ;;  %s198_s21 = scalar_lea.vmem %s518_s0, %s403_s18  ;;  %s208_s27 = scalar_lea.vmem %s521_s3, %s404_s24 }
   0xf   : > { %v210_v3 = vld [vmem:[%s198_s21] sm:$0xff] }
  0x10   : > { %v219_v4 = vcombine.high %v210_v3, %v210_v3 }
  0x12   : > { %398 = vmatprep.subr.msk.mxu0 %vm224_vm0, %v219_v4 }
  0x13   : > { %399 = vmatpush1.msk.msra.mxu0 %vm224_vm0, %v210_v3 }
  0x14   : > { %400 = vmatmul.mubr.msk.f32.vlgmr.msra.gmra.mxu0 %vm220_vm1, %v211_v5 }
  0x89   : > { %v216_v6 = vpop.permute.xlu0 %215 }
  0xd4   : > { %v295_v7 = vpop.f32.mrf.mxu0 }
  0xd5   : > { %v296_v8 = vadd.f32 %v295_v7, %v216_v6 }
  0xd6   : > { %v297_v9 = vpop.f32.mrf.mxu0 }
  0xd7   : > { %300 = vst [vmem:[%s208_s27] sm:$0xff] %v296_v8  ;;  %v298_v10 = vadd.f32 %v297_v9, %v216_v6 }
  0xd9   : > { %301 = vst [vmem:[%s208_s27 + $0x8] sm:$0xff] %v298_v10 }
  0xda PF: > { %s13_s14 = sadd.s32 1, %s455_s14   ;;  %s522_s12 = smov %s451_s13 }
  0xdb   : > { %p10_p5 = scmp.ge.s32.totalorder %s13_s14, 4   ;;  %s523_s13 = smov %s525_s15 }
  0xdd   :  { %12 = sbr.rel (!%p10_p5) target bundleno = 2 (0x2), region = 62 }

// kernel: multi_head_local_attention_2d.9
= control target key start
LH: loop header
LB: loop body
LE: loop exit
PB: predicated region body
PF: predicated region fallthrough
CT: control target
= control target key end

     0   :  { %s470_s12 = smov 0   ;;  %s472_s13 = smov 0   ;;  %s509_s0 = inlined_call_operand.vmem [shape: f32[2,8,256], index: 0, kind: input, shape index: {}]   ;;  %s510_s1 = inlined_call_operand.vmem [shape: f32[8,8], index: 1, kind: input, shape index: {}]   ;;  %s511_s2 = inlined_call_operand.vmem [shape: f32[8,1], index: 2, kind: input, shape index: {}]   ;;  %s512_s3 = inlined_call_operand.vmem [shape: f32[2,8,256], index: 3, kind: output, shape index: {}]  }
   0x1   :  { %s474_s14 = smov 0  }
   0x2 LB: > { %s25_s15 = sadd.s32 1, %s442_s13  ;;  %p387_p0 = scmp.ge.s32.totalorder %s446_s14, 1  ;;  %s446_s14 = sphi %s474_s14, %s13_s14   ;;  %s442_s13 = sphi %s472_s13, %s514_s13   ;;  %s438_s12 = sphi %s470_s12, %s513_s12  }
   0x3   : > { %p27_p1 = scmp.ge.s32.totalorder %s25_s15, 2  ;;  %p158_p2 = scmp.lt.s32.totalorder %s446_s14, 3 }
   0x5   : > { %s516_s15 = smov (%p27_p1, %s25_s15), 0  ;;  %p159_p3 = pnand %p387_p0, %p158_p2 }
   0x6   : > { %p191_p4 = scmp.lt.s32.totalorder (!%p159_p3), %s438_s12, 1 }
   0x7   : > { %162 = sbr.rel (%p159_p3) target bundleno = 216 (0xd8), region = 32 }
   0xc   : > { %v213_v0 = vld [vmem:[%s511_s2] sm:$0xff]  ;;  %v448_v1 = vmov 0.0   ;;  %v449_v2 = vmov 0   ;;  %s518_s12 = smov (!%p191_p4, %s438_s12), 1  ;;  %vm219_vm0 = vcmask 64512  }
   0xd   : > { %287 = vmatprep.mubr.f32.mxu0 %v448_v1  ;;  %423 = vset.pattern.permute.xlu0 %v449_v2  ;;  %s395_s18 = sshll.u32 %s518_s12, 4  ;;  %v212_v5 = vld [vmem:[%s510_s1] sm:$0xff] }
   0xe   : > { %216 = vperm.xlu0 %423, %v213_v0   ;;  %s198_s21 = scalar_lea.vmem %s509_s0, %s395_s18  ;;  %s208_s26 = scalar_lea.vmem %s512_s3, %s395_s18 }
   0xf   : > { %v211_v3 = vld [vmem:[%s198_s21 + $0x8] sm:$0xff]  ;;  %v210_v4 = vld [vmem:[%s198_s21] sm:$0xff] }
  0x10   : > { %253 = vmatprep.subr.mxu0 %v211_v3 }
  0x11   : > { %254 = vmatpush1.msra.mxu0 %v210_v4 }
  0x12   : > { %392 = vmatmul.mubr.msk.f32.vlgmr.msra.gmra.mxu0 %vm219_vm0, %v212_v5 }
  0x89   : > { %v217_v6 = vpop.permute.xlu0 %216 }
  0xd2   : > { %v289_v7 = vpop.f32.mrf.mxu0 }
  0xd3   : > { %v290_v8 = vadd.f32 %v289_v7, %v217_v6 }
  0xd4   : > { %v291_v9 = vpop.f32.mrf.mxu0 }
  0xd5   : > { %294 = vst [vmem:[%s208_s26] sm:$0xff] %v290_v8  ;;  %v292_v10 = vadd.f32 %v291_v9, %v217_v6 }
  0xd7   : > { %295 = vst [vmem:[%s208_s26 + $0x8] sm:$0xff] %v292_v10 }
  0xd8 PF: > { %s13_s14 = sadd.s32 1, %s446_s14   ;;  %s513_s12 = smov %s442_s13 }
  0xd9   : > { %p10_p5 = scmp.ge.s32.totalorder %s13_s14, 4   ;;  %s514_s13 = smov %s516_s15 }
  0xdb   :  { %12 = sbr.rel (!%p10_p5) target bundleno = 2 (0x2), region = 62 }

// kernel: multi_head_local_attention_2d.8
= control target key start
LH: loop header
LB: loop body
LE: loop exit
PB: predicated region body
PF: predicated region fallthrough
CT: control target
= control target key end

     0   :  { %s1559_s12 = smov 0   ;;  %s1561_s13 = smov 0   ;;  %s2674_s0 = inlined_call_operand.vmem [shape: f32[2,8,16,16], index: 0, kind: input, shape index: {}]   ;;  %s2675_s1 = inlined_call_operand.vmem [shape: f32[2,8,18,18], index: 1, kind: input, shape index: {}]   ;;  %s2676_s2 = inlined_call_operand.vmem [shape: f32[2,8,18,18], index: 2, kind: input, shape index: {}]   ;;  %s2677_s3 = inlined_call_operand.vmem [shape: f32[2,8,16,16], index: 3, kind: output, shape index: {}]  }
   0x1   :  { %s1563_s14 = smov 0   ;;  %s1565_s15 = smov 0  }
   0x2   :  { %s1567_s16 = smov 0  }
   0x3 LB: > { %s22_s17 = sadd.s32 1, %s1527_s14  ;;  %s25_s18 = sadd.s32 1, %s1531_s15  ;;  %s1535_s16 = sphi %s1567_s16, %s13_s16   ;;  %s1531_s15 = sphi %s1565_s15, %s2757_s15   ;;  %s1527_s14 = sphi %s1563_s14, %s2756_s14   ;;  %s1523_s13 = sphi %s1561_s13, %s2755_s13   ;;  %s1519_s12 = sphi %s1559_s12, %s2754_s12  }
   0x4   : > { %p23_p0 = scmp.ge.s32.totalorder %s22_s17, 2  ;;  %p1397_p1 = scmp.ge.s32.totalorder %s1535_s16, 1 }
   0x5   : > { %p195_p2 = scmp.lt.s32.totalorder %s1535_s16, 5 }
   0x6   : > { %s2759_s17 = smov (%p23_p0, %s22_s17), 0  ;;  %s2761_s18 = smov (!%p23_p0, %s25_s18), %s1531_s15 }
   0x7   : > { %p196_p3 = pnand %p1397_p1, %p195_p2  ;;  %p27_p4 = scmp.ge.s32.totalorder %s2761_s18, 2 }
   0x9   : > { %s2763_s18 = smov (%p27_p4, %s2761_s18), 0  ;;  %199 = sbr.rel (%p196_p3) target bundleno = 335 (0x14f), region = 32 }
   0xe   : > { %s1398_s19 = sshll.u32 %s1519_s12, 2  ;;  %p250_p5 = scmp.lt.s32.totalorder %s1523_s13, 1  ;;  %vm460_vm0 = vcmask 1046528   ;;  %vm341_vm1 = vcmask 130048   ;;  %vm603_vm2 = vcmask 1045504  }
   0xf   : > { %p252_p6 = scmp.lt.s32.totalorder %s1398_s19, 7  ;;  %s1537_s7 = smov 127  }
  0x10   : > { %s2765_s13 = smov (!%p250_p5, %s1523_s13), 1  ;;  %s1538_s8 = smov 126  }
  0x11   : > { %s2767_s19 = smov (!%p252_p6, %s1398_s19), 7  ;;  %s1400_s20 = sshll.u32 %s2765_s13, 4 }
  0x12   : > { %s1413_s21 = smul.u32 24, %s2765_s13  ;;  %s1399_s23 = sshll.u32 %s2767_s19, 1 }
  0x13   : > { %s1412_s22 = smul.u32 3, %s2767_s19  ;;  %s1589_s24 = sadd.s32 %s1400_s20, %s1399_s23 }
  0x14   : > { %s1401_s26 = sshll.u32 %s1589_s24, 3 }
  0x15   : > { %s1591_s25 = sadd.s32 %s1413_s21, %s1412_s22  ;;  %s1600_s30 = scalar_lea.vmem %s2674_s0, %s1401_s26 }
  0x16   : > { %s1403_s27 = sshll.u32 %s1591_s25, 3  ;;  %v295_v0 = vld [vmem:[%s1600_s30 + $0x10] sm:$0xff]  ;;  %v293_v1 = vld [vmem:[%s1600_s30] sm:$0xff]  ;;  %v296_v2 = vld [vmem:[%s1600_s30 + $0x18] sm:$0xff]  ;;  %s291_s19 = scalar_lea.vmem %s2677_s3, %s1401_s26 }
  0x17   : > { %s1607_s6 = scalar_lea.vmem %s2675_s1, %s1403_s27  ;;  %v1615_v4 = vmul.f32 0.35355338, %v295_v0  ;;  %v1620_v6 = vmul.f32 0.35355338, %v293_v1  ;;  %v1626_v7 = vmul.f32 0.35355338, %v296_v2  ;;  %s1812_s11 = scalar_lea.vmem %s2676_s2, %s1403_s27 }
  0x18   : > { %v1613_v3 = vld [vmem:[%s1607_s6 + $0x18] sm:$0xff]  ;;  %v1618_v5 = vld [vmem:[%s1607_s6] sm:$0xff]  ;;  %v1629_v8 = vld [vmem:[%s1607_s6 + $0x8] sm:$0xff] }
  0x19   : > { %368 = vrot.lane.b32.xlu1 %v1613_v3, %s1537_s7  ;;  %364 = vrot.lane.b32.xlu0 %v1618_v5, %s1537_s7  ;;  %v461_v9 = vrot.slane %v1618_v5, 1  ;;  %v335_v10 = vmul.f32 %v1613_v3, %v1615_v4  ;;  %v333_v11 = vmul.f32 %v1618_v5, %v1620_v6  ;;  %v1637_v12 = vld [vmem:[%s1607_s6 + $0x20] sm:$0xff]  ;;  %v294_v13 = vld [vmem:[%s1600_s30 + $0x8] sm:$0xff]  ;;  %v462_v15 = vrot.slane %v1629_v8, 1 }
  0x1a   : > { %v298_v14 = vld [vmem:[%s1600_s30 + $0x28] sm:$0xff]  ;;  %v336_v16 = vmul.f32 %v1637_v12, %v1626_v7  ;;  %v1644_v17 = vmul.f32 0.35355338, %v294_v13  ;;  %v297_v18 = vld [vmem:[%s1600_s30 + $0x20] sm:$0xff]  ;;  %v466_v19 = vrot.slane %v1613_v3, 1  ;;  %v300_v23 = vld [vmem:[%s1600_s30 + $0x38] sm:$0xff] }
  0x1b   : > { %v343_v20 = vsel %vm341_vm1, %v335_v10, 0.0  ;;  %v342_v21 = vsel %vm341_vm1, %v333_v11, 0.0  ;;  %v1650_v22 = vmul.f32 0.35355338, %v298_v14  ;;  %v467_v24 = vrot.slane %v1637_v12, 1  ;;  %v299_v28 = vld [vmem:[%s1600_s30 + $0x30] sm:$0xff] }
  0x1c   : > { %v1654_v25 = vadd.f32 %v343_v20, %v342_v21  ;;  %v350_v26 = vsel %vm341_vm1, %v336_v16, 0.0  ;;  %v334_v27 = vmul.f32 %v1629_v8, %v1644_v17  ;;  %v1665_v29 = vsel %vm460_vm0, %v461_v9, %v462_v15  ;;  %v1668_v30 = vld [vmem:[%s1607_s6 + $0x38] sm:$0xff]  ;;  %v1671_v31 = vld [vmem:[%s1607_s6 + $0x30] sm:$0xff]  ;;  %v314_v38 = vld [vmem:[%s1607_s6 + $0x28] sm:$0x3] }
  0x1d   : > { %370 = vrot.lane.b32.xlu1 %v1637_v12, %s1537_s7  ;;  %366 = vrot.lane.b32.xlu0 %v1629_v8, %s1537_s7  ;;  %v1673_v32 = vmul.f32 0.35355338, %v297_v18  ;;  %v311_v33 = vld [vmem:[%s1607_s6 + $0x10] sm:$0x3]  ;;  %v489_v34 = vmul.f32 %v1665_v29, %v1620_v6  ;;  %v1679_v36 = vmul.f32 0.35355338, %v300_v23  ;;  %v1687_v41 = vsel %vm460_vm0, %v466_v19, %v467_v24 }
  0x1e   : > { %v349_v35 = vsel %vm341_vm1, %v334_v27, 0.0  ;;  %v464_v37 = vrot.slane %v311_v33, 1  ;;  %v1684_v40 = vmul.f32 0.35355338, %v299_v28  ;;  %v1690_v42 = vld [vmem:[%s1607_s6 + $0x40] sm:$0x3]  ;;  %v491_v47 = vmul.f32 %v1687_v41, %v1615_v4 }
  0x1f   : > { %v1682_v39 = vadd.f32 %v350_v26, %v349_v35  ;;  %v1693_v43 = vld [vmem:[%s1607_s6 + $0x58] sm:$0x3]  ;;  %v497_v45 = vsel %vm341_vm1, %v489_v34, 0.0  ;;  %v469_v46 = vrot.slane %v314_v38, 1  ;;  %v1706_v48 = vld [vmem:[%s1607_s6 + $0x50] sm:$0xff]  ;;  %v1709_v49 = vld [vmem:[%s1607_s6 + $0x48] sm:$0xff] }
  0x20   : > { %v1700_v44 = vsel %vm460_vm0, %v462_v15, %v464_v37  ;;  %v472_v51 = vrot.slane %v1668_v30, 1  ;;  %v474_v52 = vrot.slane %v1690_v42, 1  ;;  %v471_v53 = vrot.slane %v1671_v31, 1 }
  0x21   : > { %374 = vrot.lane.b32.xlu1 %v1668_v30, %s1537_s7  ;;  %372 = vrot.lane.b32.xlu0 %v1671_v31, %s1537_s7  ;;  %v490_v50 = vmul.f32 %v1700_v44, %v1644_v17  ;;  %v1717_v54 = vsel %vm460_vm0, %v467_v24, %v469_v46  ;;  %v498_v55 = vsel %vm341_vm1, %v491_v47, 0.0  ;;  %v477_v56 = vrot.slane %v1706_v48, 1 }
  0x22   : > { %v479_v57 = vrot.slane %v1693_v43, 1  ;;  %v492_v59 = vmul.f32 %v1717_v54, %v1626_v7  ;;  %v499_v60 = vadd.f32 %v498_v55, %v497_v45  ;;  %v1726_v61 = vsel %vm460_vm0, %v472_v51, %v474_v52 }
  0x23   : > { %v504_v58 = vsel %vm341_vm1, %v490_v50, 0.0  ;;  %v494_v62 = vmul.f32 %v1726_v61, %v1650_v22  ;;  %v1735_v63 = vsel %vm460_vm0, %v471_v53, %v472_v51  ;;  %v476_v1 = vrot.slane %v1709_v49, 1 }
  0x24   : > { %v1738_v0 = vsel %vm460_vm0, %v477_v56, %v479_v57  ;;  %v505_v2 = vsel %vm341_vm1, %v492_v59, 0.0  ;;  %v493_v9 = vmul.f32 %v1735_v63, %v1673_v32  ;;  %v605_v11 = vrot.slane %v1629_v8, 2 }
  0x25   : > { %378 = vrot.lane.b32.xlu1 %v1706_v48, %s1537_s7  ;;  %376 = vrot.lane.b32.xlu0 %v1709_v49, %s1537_s7  ;;  %v496_v10 = vmul.f32 %v1738_v0, %v1679_v36  ;;  %v506_v13 = vadd.f32 %v505_v2, %v504_v58  ;;  %v507_v14 = vsel %vm341_vm1, %v494_v62, 0.0  ;;  %v1749_v15 = vsel %vm460_vm0, %v476_v1, %v477_v56 }
  0x26   : > { %v607_v16 = vrot.slane %v311_v33, 2  ;;  %v500_v18 = vsel %vm341_vm1, %v493_v9, 0.0  ;;  %v495_v20 = vmul.f32 %v1749_v15, %v1684_v40  ;;  %v604_v21 = vrot.slane %v1618_v5, 2 }
  0x27   : > { %v509_v19 = vsel %vm341_vm1, %v496_v10, 0.0  ;;  %v508_v23 = vadd.f32 %v507_v14, %v506_v13  ;;  %v501_v24 = vadd.f32 %v500_v18, %v499_v60  ;;  %v610_v27 = vrot.slane %v1637_v12, 2  ;;  %v323_v13 = vld [vmem:[%s1812_s11 + $0x10] sm:$0x3]  ;;  %v1836_v18 = vld [vmem:[%s1812_s11 + $0x8] sm:$0xff] }
  0x28   : > { %v1761_v26 = vsel %vm603_vm2, %v605_v11, %v607_v16  ;;  %v502_v28 = vsel %vm341_vm1, %v495_v20, 0.0  ;;  %v1768_v34 = vsel %vm603_vm2, %v604_v21, %v605_v11  ;;  %v612_v35 = vrot.slane %v314_v38, 2 }
  0x29   : > { %412 = vrot.lane.b32.xlu1 %v1629_v8, %s1538_s8  ;;  %410 = vrot.lane.b32.xlu0 %v1618_v5, %s1538_s8  ;;  %v633_v33 = vmul.f32 %v1761_v26, %v1644_v17  ;;  %v1770_v8 = vadd.f32 %v509_v19, %v508_v23  ;;  %v1772_v37 = vadd.f32 %v502_v28, %v501_v24  ;;  %v609_v45 = vrot.slane %v1613_v3, 2  ;;  %v326_v19 = vld [vmem:[%s1812_s11 + $0x28] sm:$0x3]  ;;  %v1843_v23 = vld [vmem:[%s1812_s11 + $0x20] sm:$0xff] }
  0x2a   : > { %v632_v5 = vmul.f32 %v1768_v34, %v1620_v6  ;;  %v1778_v46 = vsel %vm603_vm2, %v610_v27, %v612_v35  ;;  %v615_v47 = vrot.slane %v1668_v30, 2  ;;  %v617_v50 = vrot.slane %v1690_v42, 2 }
  0x2b   : > { %v647_v38 = vsel %vm341_vm1, %v633_v33, 0.0  ;;  %v635_v51 = vmul.f32 %v1778_v46, %v1626_v7  ;;  %v1790_v52 = vsel %vm603_vm2, %v609_v45, %v610_v27  ;;  %v614_v53 = vrot.slane %v1671_v31, 2  ;;  %v329_v27 = vld [vmem:[%s1812_s11 + $0x40] sm:$0x3]  ;;  %v1854_v33 = vld [vmem:[%s1812_s11 + $0x38] sm:$0xff] }
  0x2c   : > { %v640_v55 = vsel %vm341_vm1, %v632_v5, 0.0  ;;  %v634_v42 = vmul.f32 %v1790_v52, %v1615_v4  ;;  %v619_v59 = vrot.slane %v1709_v49, 2  ;;  %v338_v2 = vmul.f32 %v1668_v30, %v1650_v22  ;;  %v332_v45 = vld [vmem:[%s1812_s11 + $0x58] sm:$0x3] }
  0x2d   : > { %416 = vrot.lane.b32.xlu1 %v1637_v12, %s1538_s8  ;;  %414 = vrot.lane.b32.xlu0 %v1613_v3, %s1538_s8  ;;  %v1797_v12 = vsel %vm603_vm2, %v615_v47, %v617_v50  ;;  %v620_v3 = vrot.slane %v1706_v48, 2  ;;  %v648_v56 = vsel %vm341_vm1, %v635_v51, 0.0  ;;  %v1804_v58 = vsel %vm603_vm2, %v614_v53, %v615_v47  ;;  %v1868_v53 = vld [vmem:[%s1812_s11 + $0x50] sm:$0xff] }
  0x2e   : > { %v637_v57 = vmul.f32 %v1797_v12, %v1650_v22  ;;  %v649_v60 = vadd.f32 %v648_v56, %v647_v38  ;;  %v641_v62 = vsel %vm341_vm1, %v634_v42, 0.0  ;;  %v636_v1 = vmul.f32 %v1804_v58, %v1673_v32 }
  0x2f   : > { %v642_v9 = vadd.f32 %v641_v62, %v640_v55  ;;  %v1827_v11 = vsel %vm603_vm2, %v619_v59, %v620_v3  ;;  %v337_v14 = vmul.f32 %v1671_v31, %v1673_v32  ;;  %v997_v21 = vrot.slane %v1836_v18, 1 }
  0x30   : > { %v650_v10 = vsel %vm341_vm1, %v637_v57, 0.0  ;;  %v999_v24 = vrot.slane %v323_v13, 1  ;;  %v352_v28 = vsel %vm341_vm1, %v338_v2, 0.0  ;;  %v1002_v35 = vrot.slane %v1843_v23, 1 }
  0x31   : > { %420 = vrot.lane.b32.xlu1 %v1668_v30, %s1538_s8  ;;  %418 = vrot.lane.b32.xlu0 %v1671_v31, %s1538_s8  ;;  %v1832_v16 = vadd.f32 %v650_v10, %v649_v60  ;;  %v643_v30 = vsel %vm341_vm1, %v636_v1, 0.0  ;;  %v340_v31 = vmul.f32 %v1706_v48, %v1679_v36  ;;  %v1004_v5 = vrot.slane %v326_v19, 1 }
  0x32   : > { %v1839_v20 = vadd.f32 %v643_v30, %v642_v9  ;;  %v345_v47 = vsel %vm341_vm1, %v337_v14, 0.0  ;;  %v339_v50 = vmul.f32 %v1709_v49, %v1684_v40  ;;  %v1864_v38 = vsel %vm460_vm0, %v997_v21, %v999_v24 }
  0x33   : > { %v1007_v51 = vrot.slane %v1854_v33, 1  ;;  %v1873_v55 = vsel %vm460_vm0, %v1002_v35, %v1004_v5  ;;  %v1009_v42 = vrot.slane %v329_v27, 1  ;;  %v1012_v56 = vrot.slane %v1868_v53, 1 }
  0x34   : > { %v1014_v57 = vrot.slane %v332_v45, 1  ;;  %v353_v59 = vadd.f32 %v352_v28, %v1682_v39  ;;  %v354_v60 = vsel %vm341_vm1, %v340_v31, 0.0  ;;  %v346_v62 = vadd.f32 %v345_v47, %v1654_v25 }
  0x35   : > { %424 = vrot.lane.b32.xlu1 %v1706_v48, %s1538_s8  ;;  %422 = vrot.lane.b32.xlu0 %v1709_v49, %s1538_s8  ;;  %v1883_v49 = vsel %vm460_vm0, %v1007_v51, %v1009_v42  ;;  %v347_v2 = vsel %vm341_vm1, %v339_v50, 0.0  ;;  %v1121_v14 = vrot.slane %v1836_v18, 2  ;;  %v1123_v30 = vrot.slane %v323_v13, 2  ;;  %v2003_v48 = vld [vmem:[%s1812_s11 + $0x30] sm:$0xff] }
  0x36   : > { %v1891_v1 = vsel %vm460_vm0, %v1012_v56, %v1014_v57  ;;  %v1894_v9 = vadd.f32 %v354_v60, %v353_v59  ;;  %v1896_v10 = vadd.f32 %v347_v2, %v346_v62  ;;  %v2680_v39 = vrot.slane %v1843_v23, 2  ;;  %2708 = vst [vmem:[#allocation7_spill] sm:$0xff] %v2003_v48 }
  0x37   : > { %v1128_v24 = vrot.slane %v326_v19, 2  ;;  %v1907_v25 = vsel %vm603_vm2, %v1121_v14, %v1123_v30  ;;  %v2679_v13 = vrot.slane %v1854_v33, 2  ;;  %v1133_v31 = vrot.slane %v329_v27, 2 }
  0x38   : > { %2703 = vst [vmem:[#allocation2_spill] sm:$0xff] %v1907_v25  ;;  %v2678_v5 = vrot.slane %v1868_v53, 2  ;;  %v1138_v47 = vrot.slane %v332_v45, 2 }
  0x39   : > { %513 = vrot.lane.b32.xlu1 %v1700_v44, %s1537_s7  ;;  %511 = vrot.lane.b32.xlu0 %v1665_v29, %s1537_s7  ;;  %v1912_v28 = vsel %vm603_vm2, %v2680_v39, %v1128_v24  ;;  %v1922_v19 = vsel %vm603_vm2, %v2679_v13, %v1133_v31 }
  0x3a   : > { %2704 = vst [vmem:[#allocation3_spill] sm:$0xff] %v1912_v28  ;;  %2705 = vst [vmem:[#allocation4_spill] sm:$0xff] %v1922_v19  ;;  %v1928_v50 = vsel %vm603_vm2, %v2678_v5, %v1138_v47 }
  0x3b   : > { %2706 = vst [vmem:[#allocation5_spill] sm:$0xff] %v1928_v50 }
  0x3d   : > { %517 = vrot.lane.b32.xlu1 %v1717_v54, %s1537_s7  ;;  %515 = vrot.lane.b32.xlu0 %v1687_v41, %s1537_s7 }
  0x41   : > { %521 = vrot.lane.b32.xlu1 %v1726_v61, %s1537_s7  ;;  %519 = vrot.lane.b32.xlu0 %v1735_v63, %s1537_s7 }
  0x45   : > { %525 = vrot.lane.b32.xlu1 %v1738_v0, %s1537_s7  ;;  %523 = vrot.lane.b32.xlu0 %v1749_v15, %s1537_s7 }
  0x49   : > { %559 = vrot.lane.b32.xlu1 %v1700_v44, %s1538_s8  ;;  %557 = vrot.lane.b32.xlu0 %v1665_v29, %s1538_s8  ;;  %v622_v29 = vrot.slane %v1693_v43, 2  ;;  %v1989_v43 = vld [vmem:[%s1812_s11] sm:$0xff]  ;;  %v1996_v44 = vld [vmem:[%s1812_s11 + $0x18] sm:$0xff] }
  0x4a   : > { %2707 = vst [vmem:[#allocation6_spill] sm:$0xff] %v1996_v44  ;;  %v996_v42 = vrot.slane %v1989_v43, 1  ;;  %v1001_v47 = vrot.slane %v1996_v44, 1 }
  0x4c   : > { %v2048_v31 = vsel %vm460_vm0, %v996_v42, %v997_v21 }
  0x4d   : > { %563 = vrot.lane.b32.xlu1 %v1717_v54, %s1538_s8  ;;  %561 = vrot.lane.b32.xlu0 %v1687_v41, %s1538_s8  ;;  %v1978_v41 = vsel %vm603_vm2, %v620_v3, %v622_v29  ;;  %v2010_v54 = vld [vmem:[%s1812_s11 + $0x48] sm:$0xff]  ;;  %2710 = vst [vmem:[#allocation9_spill] sm:$0xff] %v2048_v31 }
  0x4e   : > { %2709 = vst [vmem:[#allocation8_spill] sm:$0xff] %v2010_v54 }
  0x51   : > { %567 = vrot.lane.b32.xlu1 %v1726_v61, %s1538_s8  ;;  %565 = vrot.lane.b32.xlu0 %v1735_v63, %s1538_s8 }
  0x55   : > { %656 = vrot.lane.b32.xlu1 %v1761_v26, %s1537_s7  ;;  %654 = vrot.lane.b32.xlu0 %v1768_v34, %s1537_s7 }
  0x59   : > { %660 = vrot.lane.b32.xlu1 %v1778_v46, %s1537_s7  ;;  %658 = vrot.lane.b32.xlu0 %v1790_v52, %s1537_s7 }
  0x5d   : > { %702 = vrot.lane.b32.xlu1 %v1761_v26, %s1538_s8  ;;  %700 = vrot.lane.b32.xlu0 %v1768_v34, %s1538_s8 }
  0x61   : > { %706 = vrot.lane.b32.xlu1 %v1778_v46, %s1538_s8  ;;  %704 = vrot.lane.b32.xlu0 %v1790_v52, %s1538_s8 }
  0x65   : > { %571 = vrot.lane.b32.xlu1 %v1738_v0, %s1538_s8  ;;  %569 = vrot.lane.b32.xlu0 %v1749_v15, %s1538_s8 }
  0x69   : > { %664 = vrot.lane.b32.xlu1 %v1797_v12, %s1537_s7  ;;  %662 = vrot.lane.b32.xlu0 %v1804_v58, %s1537_s7 }
  0x6d   : > { %710 = vrot.lane.b32.xlu1 %v1797_v12, %s1538_s8  ;;  %708 = vrot.lane.b32.xlu0 %v1804_v58, %s1538_s8 }
  0x71   : > { %668 = vrot.lane.b32.xlu1 %v1978_v41, %s1537_s7  ;;  %666 = vrot.lane.b32.xlu0 %v1827_v11, %s1537_s7 }
  0x75   : > { %714 = vrot.lane.b32.xlu1 %v1978_v41, %s1538_s8  ;;  %712 = vrot.lane.b32.xlu0 %v1827_v11, %s1538_s8 }
  0x79   : > { %914 = vrot.lane.b32.xlu1 %v1836_v18, %s1537_s7  ;;  %912 = vrot.lane.b32.xlu0 %v1989_v43, %s1537_s7 }
  0x7d   : > { %918 = vrot.lane.b32.xlu1 %v1843_v23, %s1537_s7  ;;  %916 = vrot.lane.b32.xlu0 %v1996_v44, %s1537_s7 }
  0x81   : > { %922 = vrot.lane.b32.xlu1 %v1854_v33, %s1537_s7  ;;  %920 = vrot.lane.b32.xlu0 %v2003_v48, %s1537_s7 }
  0x85   : > { %926 = vrot.lane.b32.xlu1 %v1868_v53, %s1537_s7  ;;  %924 = vrot.lane.b32.xlu0 %v2010_v54, %s1537_s7 }
  0x89   : > { %954 = vrot.lane.b32.xlu1 %v1836_v18, %s1538_s8  ;;  %952 = vrot.lane.b32.xlu0 %v1989_v43, %s1538_s8 }
  0x8b   : > { %v369_v61 = vpop.permute.xlu1 %368  ;;  %v365_v63 = vpop.permute.xlu0 %364 }
  0x8c   : > { %v390_v0 = vmul.f32 %v369_v61, %v1615_v4  ;;  %v388_v15 = vmul.f32 %v365_v63, %v1620_v6 }
  0x8d   : > { %958 = vrot.lane.b32.xlu1 %v1843_v23, %s1538_s8  ;;  %956 = vrot.lane.b32.xlu0 %v1996_v44, %s1538_s8 }
  0x8e   : > { %v397_v26 = vsel %vm341_vm1, %v390_v0, 0.0  ;;  %v396_v34 = vsel %vm341_vm1, %v388_v15, 0.0 }
  0x8f   : > { %v398_v46 = vadd.f32 %v397_v26, %v396_v34  ;;  %v371_v52 = vpop.permute.xlu1 %370  ;;  %v367_v12 = vpop.permute.xlu0 %366  ;;  %v1006_v34 = vrot.slane %v2003_v48, 1 }
  0x90   : > { %v391_v3 = vmul.f32 %v371_v52, %v1626_v7  ;;  %v389_v58 = vmul.f32 %v367_v12, %v1644_v17 }
  0x91   : > { %962 = vrot.lane.b32.xlu1 %v1854_v33, %s1538_s8  ;;  %960 = vrot.lane.b32.xlu0 %v2003_v48, %s1538_s8 }
  0x92   : > { %v404_v27 = vsel %vm341_vm1, %v391_v3, 0.0  ;;  %v403_v45 = vsel %vm341_vm1, %v389_v58, 0.0  ;;  %v2069_v3 = vsel %vm341_vm1, %v1770_v8, -inf }
  0x93   : > { %v405_v57 = vadd.f32 %v404_v27, %v403_v45  ;;  %v375_v59 = vpop.permute.xlu1 %374  ;;  %v373_v60 = vpop.permute.xlu0 %372  ;;  %v2075_v27 = vsel %vm341_vm1, %v1772_v37, -inf }
  0x94   : > { %v393_v62 = vmul.f32 %v375_v59, %v1650_v22  ;;  %v392_v2 = vmul.f32 %v373_v60, %v1673_v32  ;;  %v2092_v59 = vsel %vm460_vm0, %v1006_v34, %v1007_v51  ;;  %v1011_v60 = vrot.slane %v2010_v54, 1 }
  0x95   : > { %966 = vrot.lane.b32.xlu1 %v1868_v53, %s1538_s8  ;;  %964 = vrot.lane.b32.xlu0 %v2010_v54, %s1538_s8  ;;  %2712 = vst [vmem:[#allocation11_spill] sm:$0xff] %v2092_v59 }
  0x96   : > { %v406_v30 = vsel %vm341_vm1, %v393_v62, 0.0  ;;  %v399_v24 = vsel %vm341_vm1, %v392_v2, 0.0  ;;  %v2110_v51 = vsel %vm460_vm0, %v1011_v60, %v1012_v56  ;;  %v639_v2 = vmul.f32 %v1978_v41, %v1679_v36 }
  0x97   : > { %v407_v29 = vadd.f32 %v406_v30, %v405_v57  ;;  %v400_v61 = vadd.f32 %v399_v24, %v398_v46  ;;  %v379_v63 = vpop.permute.xlu1 %378  ;;  %v377_v0 = vpop.permute.xlu0 %376  ;;  %v2063_v46 = vsel %vm460_vm0, %v1001_v47, %v1002_v35  ;;  %2713 = vst [vmem:[#allocation12_spill] sm:$0xff] %v2110_v51  ;;  %v638_v62 = vmul.f32 %v1827_v11, %v1684_v40 }
  0x98   : > { %v395_v15 = vmul.f32 %v379_v63, %v1679_v36  ;;  %v394_v26 = vmul.f32 %v377_v0, %v1684_v40  ;;  %2711 = vst [vmem:[#allocation10_spill] sm:$0xff] %v2063_v46  ;;  %v652_v13 = vsel %vm341_vm1, %v639_v2, 0.0 }
  0x99   : > { %1042 = vrot.lane.b32.xlu1 %v1864_v38, %s1537_s7  ;;  %1040 = vrot.lane.b32.xlu0 %v2048_v31, %s1537_s7  ;;  %v645_v39 = vsel %vm341_vm1, %v638_v62, 0.0 }
  0x9a   : > { %v408_v21 = vsel %vm341_vm1, %v395_v15, 0.0  ;;  %v401_v52 = vsel %vm341_vm1, %v394_v26, 0.0 }
  0x9b   : > { %v2065_v12 = vadd.f32 %v408_v21, %v407_v29  ;;  %v2071_v58 = vadd.f32 %v401_v52, %v400_v61  ;;  %v413_v45 = vpop.permute.xlu1 %412  ;;  %v411_v42 = vpop.permute.xlu0 %410 }
  0x9c   : > { %v435_v30 = vmul.f32 %v413_v45, %v1644_v17  ;;  %v434_v24 = vmul.f32 %v411_v42, %v1620_v6 }
  0x9d   : > { %v2079_v57 = vsel %vm341_vm1, %v2065_v12, -inf  ;;  %v2083_v35 = vsel %vm341_vm1, %v2071_v58, -inf  ;;  %1046 = vrot.lane.b32.xlu1 %v1873_v55, %s1537_s7  ;;  %1044 = vrot.lane.b32.xlu0 %v2063_v46, %s1537_s7 }
  0x9e   : > { %v449_v0 = vsel %vm341_vm1, %v435_v30, 0.0  ;;  %v442_v15 = vsel %vm341_vm1, %v434_v24, 0.0 }
  0x9f   : > { %v417_v47 = vpop.permute.xlu1 %416  ;;  %v415_v29 = vpop.permute.xlu0 %414 }
  0xa0   : > { %v437_v61 = vmul.f32 %v417_v47, %v1626_v7  ;;  %v436_v63 = vmul.f32 %v415_v29, %v1615_v4 }
  0xa1   : > { %1050 = vrot.lane.b32.xlu1 %v1883_v49, %s1537_s7  ;;  %1048 = vrot.lane.b32.xlu0 %v2092_v59, %s1537_s7 }
  0xa2   : > { %v450_v26 = vsel %vm341_vm1, %v437_v61, 0.0  ;;  %v443_v34 = vsel %vm341_vm1, %v436_v63, 0.0 }
  0xa3   : > { %v451_v21 = vadd.f32 %v450_v26, %v449_v0  ;;  %v444_v52 = vadd.f32 %v443_v34, %v442_v15  ;;  %v421_v45 = vpop.permute.xlu1 %420  ;;  %v419_v42 = vpop.permute.xlu0 %418 }
  0xa4   : > { %v439_v47 = vmul.f32 %v421_v45, %v1650_v22  ;;  %v438_v29 = vmul.f32 %v419_v42, %v1673_v32  ;;  %v2142_v42 = vsel %vm341_vm1, %v1896_v10, -inf }
  0xa5   : > { %1054 = vrot.lane.b32.xlu1 %v1891_v1, %s1537_s7  ;;  %1052 = vrot.lane.b32.xlu0 %v2110_v51, %s1537_s7 }
  0xa6   : > { %v452_v56 = vsel %vm341_vm1, %v439_v47, 0.0  ;;  %v445_v60 = vsel %vm341_vm1, %v438_v29, 0.0 }
  0xa7   : > { %v453_v30 = vadd.f32 %v452_v56, %v451_v21  ;;  %v446_v24 = vadd.f32 %v445_v60, %v444_v52  ;;  %v425_v61 = vpop.permute.xlu1 %424  ;;  %v423_v63 = vpop.permute.xlu0 %422  ;;  %v2136_v21 = vsel %vm341_vm1, %v1894_v9, -inf }
  0xa8   : > { %v441_v0 = vmul.f32 %v425_v61, %v1679_v36  ;;  %v440_v15 = vmul.f32 %v423_v63, %v1684_v40 }
  0xa9   : > { %1082 = vrot.lane.b32.xlu1 %v1864_v38, %s1538_s8  ;;  %1080 = vrot.lane.b32.xlu0 %v2048_v31, %s1538_s8 }
  0xaa   : > { %v454_v26 = vsel %vm341_vm1, %v441_v0, 0.0  ;;  %v447_v34 = vsel %vm341_vm1, %v440_v15, 0.0 }
  0xab   : > { %v2132_v45 = vadd.f32 %v454_v26, %v453_v30  ;;  %v2138_v52 = vadd.f32 %v447_v34, %v446_v24  ;;  %v514_v47 = vpop.permute.xlu1 %513  ;;  %v512_v29 = vpop.permute.xlu0 %511 }
  0xac   : > { %v536_v61 = vmul.f32 %v514_v47, %v1644_v17  ;;  %v535_v63 = vmul.f32 %v512_v29, %v1620_v6 }
  0xad   : > { %v765_v56 = vsel %vm341_vm1, %v2132_v45, -inf  ;;  %v748_v60 = vsel %vm341_vm1, %v2138_v52, -inf  ;;  %1086 = vrot.lane.b32.xlu1 %v1873_v55, %s1538_s8  ;;  %1084 = vrot.lane.b32.xlu0 %v2063_v46, %s1538_s8 }
  0xae   : > { %v766_v30 = vmax.f32 %v2136_v21, %v765_v56  ;;  %v749_v24 = vmax.f32 %v2142_v42, %v748_v60  ;;  %v1120_v21 = vrot.slane %v1989_v43, 2  ;;  %v550_v42 = vsel %vm341_vm1, %v536_v61, 0.0 }
  0xaf   : > { %v518_v0 = vpop.permute.xlu1 %517  ;;  %v516_v15 = vpop.permute.xlu0 %515  ;;  %v543_v47 = vsel %vm341_vm1, %v535_v63, 0.0 }
  0xb0   : > { %v538_v26 = vmul.f32 %v518_v0, %v1626_v7  ;;  %v537_v34 = vmul.f32 %v516_v15, %v1615_v4 }
  0xb1   : > { %1090 = vrot.lane.b32.xlu1 %v1883_v49, %s1538_s8  ;;  %1088 = vrot.lane.b32.xlu0 %v2092_v59, %s1538_s8 }
  0xb2   : > { %v551_v29 = vsel %vm341_vm1, %v538_v26, 0.0  ;;  %v544_v56 = vsel %vm341_vm1, %v537_v34, 0.0  ;;  %v2184_v26 = vsel %vm603_vm2, %v1120_v21, %v1121_v14  ;;  %v1125_v34 = vrot.slane %v1996_v44, 2 }
  0xb3   : > { %v552_v41 = vadd.f32 %v551_v29, %v550_v42  ;;  %v545_v60 = vadd.f32 %v544_v56, %v543_v47  ;;  %v522_v0 = vpop.permute.xlu1 %521  ;;  %v520_v11 = vpop.permute.xlu0 %519  ;;  %2714 = vst [vmem:[#allocation13_spill] sm:$0xff] %v2184_v26  ;;  %v2715_v21 = vrot.slane %v1843_v23, 2 }
  0xb4   : > { %v540_v15 = vmul.f32 %v522_v0, %v1650_v22  ;;  %v539_v5 = vmul.f32 %v520_v11, %v1673_v32  ;;  %v2190_v0 = vadd.f32 %v652_v13, %v1832_v16  ;;  %v1130_v16 = vrot.slane %v2003_v48, 2 }
  0xb5   : > { %1094 = vrot.lane.b32.xlu1 %v1891_v1, %s1538_s8  ;;  %1092 = vrot.lane.b32.xlu0 %v2110_v51, %s1538_s8 }
  0xb6   : > { %v553_v61 = vsel %vm341_vm1, %v540_v15, 0.0  ;;  %v546_v63 = vsel %vm341_vm1, %v539_v5, 0.0  ;;  %v2193_v5 = vadd.f32 %v645_v39, %v1839_v20  ;;  %v2213_v11 = vsel %vm341_vm1, %v2190_v0, -inf }
  0xb7   : > { %v554_v2 = vadd.f32 %v553_v61, %v552_v41  ;;  %v547_v42 = vadd.f32 %v546_v63, %v545_v60  ;;  %v526_v62 = vpop.permute.xlu1 %525  ;;  %v524_v47 = vpop.permute.xlu0 %523  ;;  %v2204_v41 = vsel %vm603_vm2, %v1125_v34, %v2715_v21 }
  0xb8   : > { %v542_v29 = vmul.f32 %v526_v62, %v1679_v36  ;;  %v541_v56 = vmul.f32 %v524_v47, %v1684_v40  ;;  %2716 = vst [vmem:[#allocation14_spill] sm:$0xff] %v2204_v41  ;;  %v2217_v15 = vsel %vm341_vm1, %v2193_v5, -inf  ;;  %v1135_v47 = vrot.slane %v2010_v54, 2 }
  0xb9   : > { %1166 = vrot.lane.b32.xlu1 %v1907_v25, %s1537_s7  ;;  %1164 = vrot.lane.b32.xlu0 %v2184_v26, %s1537_s7 }
  0xba   : > { %v555_v18 = vsel %vm341_vm1, %v542_v29, 0.0  ;;  %v548_v14 = vsel %vm341_vm1, %v541_v56, 0.0 }
  0xbb   : > { %v2207_v13 = vadd.f32 %v555_v18, %v554_v2  ;;  %v2209_v20 = vadd.f32 %v548_v14, %v547_v42  ;;  %v560_v39 = vpop.permute.xlu1 %559  ;;  %v558_v60 = vpop.permute.xlu0 %557  ;;  %v2717_v42 = vrot.slane %v1854_v33, 2 }
  0xbd   : > { %v769_v61 = vsel %vm341_vm1, %v2207_v13, -inf  ;;  %v752_v63 = vsel %vm341_vm1, %v2209_v20, -inf  ;;  %1170 = vrot.lane.b32.xlu1 %v1912_v28, %s1537_s7  ;;  %1168 = vrot.lane.b32.xlu0 %v2204_v41, %s1537_s7  ;;  %v2234_v62 = vsel %vm603_vm2, %v1130_v16, %v2717_v42 }
  0xbe   : > { %v2227_v34 = vmax.f32 %v766_v30, %v769_v61  ;;  %v2229_v2 = vmax.f32 %v749_v24, %v752_v63  ;;  %2718 = vst [vmem:[#allocation15_spill] sm:$0xff] %v2234_v62  ;;  %v2719_v30 = vrot.slane %v1868_v53, 2 }
  0xbf   : > { %v564_v29 = vpop.permute.xlu1 %563  ;;  %v562_v56 = vpop.permute.xlu0 %561 }
  0xc0   : > { %v2248_v24 = vsel %vm603_vm2, %v1135_v47, %v2719_v30  ;;  %v583_v51 = vmul.f32 %v562_v56, %v1615_v4 }
  0xc1   : > { %1174 = vrot.lane.b32.xlu1 %v1922_v19, %s1537_s7  ;;  %1172 = vrot.lane.b32.xlu0 %v2234_v62, %s1537_s7  ;;  %2720 = vst [vmem:[#allocation16_spill] sm:$0xff] %v2248_v24 }
  0xc2   : > { %v590_v46 = vsel %vm341_vm1, %v583_v51, 0.0 }
  0xc3   : > { %v568_v21 = vpop.permute.xlu1 %567  ;;  %v566_v16 = vpop.permute.xlu0 %565 }
  0xc4   : > { %v585_v56 = vmul.f32 %v566_v16, %v1673_v32 }
  0xc5   : > { %1178 = vrot.lane.b32.xlu1 %v1928_v50, %s1537_s7  ;;  %1176 = vrot.lane.b32.xlu0 %v2248_v24, %s1537_s7 }
  0xc6   : > { %v592_v44 = vsel %vm341_vm1, %v585_v56, 0.0 }
  0xc7   : > { %v657_v61 = vpop.permute.xlu1 %656  ;;  %v655_v63 = vpop.permute.xlu0 %654 }
  0xc8   : > { %v678_v16 = vmul.f32 %v655_v63, %v1620_v6 }
  0xc9   : > { %1206 = vrot.lane.b32.xlu1 %v1907_v25, %s1538_s8  ;;  %1204 = vrot.lane.b32.xlu0 %v2184_v26, %s1538_s8  ;;  %v584_v26 = vmul.f32 %v564_v29, %v1626_v7  ;;  %v586_v29 = vmul.f32 %v568_v21, %v1650_v22  ;;  %v679_v21 = vmul.f32 %v657_v61, %v1644_v17 }
  0xcb   : > { %v661_v42 = vpop.permute.xlu1 %660  ;;  %v659_v14 = vpop.permute.xlu0 %658 }
  0xcc   : > { %v680_v51 = vmul.f32 %v659_v14, %v1615_v4 }
  0xcd   : > { %1210 = vrot.lane.b32.xlu1 %v1912_v28, %s1538_s8  ;;  %1208 = vrot.lane.b32.xlu0 %v2204_v41, %s1538_s8  ;;  %v582_v41 = vmul.f32 %v560_v39, %v1644_v17  ;;  %v581_v28 = vmul.f32 %v558_v60, %v1620_v6  ;;  %v599_v60 = vsel %vm341_vm1, %v586_v29, 0.0 }
  0xce   : > { %v687_v63 = vsel %vm341_vm1, %v680_v51, 0.0 }
  0xcf   : > { %v703_v47 = vpop.permute.xlu1 %702  ;;  %v701_v30 = vpop.permute.xlu0 %700  ;;  %v596_v31 = vsel %vm341_vm1, %v582_v41, 0.0 }
  0xd0   : > { %v725_v29 = vmul.f32 %v703_v47, %v1644_v17 }
  0xd1   : > { %1214 = vrot.lane.b32.xlu1 %v1922_v19, %s1538_s8  ;;  %1212 = vrot.lane.b32.xlu0 %v2234_v62, %s1538_s8  ;;  %v597_v62 = vsel %vm341_vm1, %v584_v26, 0.0  ;;  %v681_v26 = vmul.f32 %v661_v42, %v1626_v7  ;;  %v724_v42 = vmul.f32 %v701_v30, %v1620_v6 }
  0xd2   : > { %v598_v54 = vadd.f32 %v597_v62, %v596_v31 }
  0xd3   : > { %v707_v18 = vpop.permute.xlu1 %706  ;;  %v705_v25 = vpop.permute.xlu0 %704  ;;  %v694_v61 = vsel %vm341_vm1, %v681_v26, 0.0 }
  0xd5   : > { %1218 = vrot.lane.b32.xlu1 %v1928_v50, %s1538_s8  ;;  %1216 = vrot.lane.b32.xlu0 %v2248_v24, %s1538_s8  ;;  %v589_v50 = vsel %vm341_vm1, %v581_v28, 0.0 }
  0xd6   : > { %v591_v24 = vadd.f32 %v590_v46, %v589_v50  ;;  %v600_v46 = vadd.f32 %v599_v60, %v598_v54 }
  0xd7   : > { %v572_v19 = vpop.permute.xlu1 %571  ;;  %v570_v59 = vpop.permute.xlu0 %569 }
  0xd8   : > { %v588_v41 = vmul.f32 %v572_v19, %v1679_v36  ;;  %v587_v28 = vmul.f32 %v570_v59, %v1684_v40  ;;  %v593_v62 = vadd.f32 %v592_v44, %v591_v24  ;;  %v727_v19 = vmul.f32 %v707_v18, %v1626_v7 }
  0xd9   : > { %v726_v59 = vmul.f32 %v705_v25, %v1615_v4  ;;  %v739_v4 = vsel %vm341_vm1, %v725_v29, 0.0  ;;  %v732_v25 = vsel %vm341_vm1, %v724_v42, 0.0 }
  0xda   : > { %v601_v44 = vsel %vm341_vm1, %v588_v41, 0.0  ;;  %v594_v17 = vsel %vm341_vm1, %v587_v28, 0.0  ;;  %v740_v26 = vsel %vm341_vm1, %v727_v19, 0.0 }
  0xdb   : > { %v665_v48 = vpop.permute.xlu1 %664  ;;  %v663_v39 = vpop.permute.xlu0 %662  ;;  %v733_v51 = vsel %vm341_vm1, %v726_v59, 0.0  ;;  %v2310_v41 = vadd.f32 %v601_v44, %v600_v46 }
  0xdc   : > { %v683_v50 = vmul.f32 %v665_v48, %v1650_v22  ;;  %v682_v31 = vmul.f32 %v663_v39, %v1673_v32  ;;  %v693_v48 = vsel %vm341_vm1, %v679_v21, 0.0  ;;  %v686_v39 = vsel %vm341_vm1, %v678_v16, 0.0 }
  0xdd   : > { %v695_v30 = vadd.f32 %v694_v61, %v693_v48  ;;  %v688_v7 = vadd.f32 %v687_v63, %v686_v39  ;;  %v771_v48 = vsel %vm341_vm1, %v2310_v41, -inf }
  0xde   : > { %v696_v6 = vsel %vm341_vm1, %v683_v50, 0.0  ;;  %v689_v54 = vsel %vm341_vm1, %v682_v31, 0.0 }
  0xdf   : > { %v711_v56 = vpop.permute.xlu1 %710  ;;  %v709_v14 = vpop.permute.xlu0 %708  ;;  %v690_v28 = vadd.f32 %v689_v54, %v688_v7 }
  0xe0   : > { %v729_v24 = vmul.f32 %v711_v56, %v1650_v22  ;;  %v728_v47 = vmul.f32 %v709_v14, %v1673_v32  ;;  %v2312_v22 = vadd.f32 %v594_v17, %v593_v62  ;;  %v697_v32 = vadd.f32 %v696_v6, %v695_v30 }
  0xe1   : > { %v741_v56 = vadd.f32 %v740_v26, %v739_v4  ;;  %v734_v14 = vadd.f32 %v733_v51, %v732_v25  ;;  %v2721_v4 = vmax.f32 %v2079_v57, %v2069_v3 }
  0xe2   : > { %v742_v50 = vsel %vm341_vm1, %v729_v24, 0.0  ;;  %v735_v31 = vsel %vm341_vm1, %v728_v47, 0.0  ;;  %v754_v39 = vsel %vm341_vm1, %v2312_v22, -inf }
  0xe3   : > { %v669_v18 = vpop.permute.xlu1 %668  ;;  %v667_v60 = vpop.permute.xlu0 %666  ;;  %v743_v44 = vadd.f32 %v742_v50, %v741_v56  ;;  %v736_v17 = vadd.f32 %v735_v31, %v734_v14  ;;  %v772_v25 = vmax.f32 %v2721_v4, %v771_v48  ;;  %v2724_v50 = vmax.f32 %v2229_v2, %v2217_v15 }
  0xe4   : > { %v685_v21 = vmul.f32 %v669_v18, %v1679_v36  ;;  %v684_v16 = vmul.f32 %v667_v60, %v1684_v40  ;;  %v2722_v18 = vmax.f32 %v2083_v35, %v2075_v27 }
  0xe6   : > { %v698_v29 = vsel %vm341_vm1, %v685_v21, 0.0  ;;  %v691_v42 = vsel %vm341_vm1, %v684_v16, 0.0  ;;  %v755_v60 = vmax.f32 %v2722_v18, %v754_v39 }
  0xe7   : > { %v699_v61 = vadd.f32 %v698_v29, %v697_v32  ;;  %v2318_v63 = vadd.f32 %v691_v42, %v690_v28  ;;  %v715_v19 = vpop.permute.xlu1 %714  ;;  %v713_v46 = vpop.permute.xlu0 %712  ;;  %v2723_v32 = vmax.f32 %v2227_v34, %v2213_v11 }
  0xe8   : > { %v731_v62 = vmul.f32 %v715_v19, %v1679_v36  ;;  %v730_v59 = vmul.f32 %v713_v46, %v1684_v40 }
  0xe9   : > { %v775_v24 = vsel %vm341_vm1, %v699_v61, -inf  ;;  %v758_v47 = vsel %vm341_vm1, %v2318_v63, -inf }
  0xea   : > { %v744_v6 = vsel %vm341_vm1, %v731_v62, 0.0  ;;  %v737_v54 = vsel %vm341_vm1, %v730_v59, 0.0  ;;  %v776_v21 = vmax.f32 %v772_v25, %v775_v24  ;;  %v759_v16 = vmax.f32 %v755_v60, %v758_v47 }
  0xeb   : > { %v745_v36 = vadd.f32 %v744_v6, %v743_v44  ;;  %v2331_v30 = vadd.f32 %v737_v54, %v736_v17  ;;  %v2333_v40 = vpop.permute.xlu1 %914  ;;  %v2335_v7 = vpop.permute.xlu0 %912 }
  0xed   : > { %v777_v26 = vsel %vm341_vm1, %v745_v36, -inf  ;;  %v760_v51 = vsel %vm341_vm1, %v2331_v30, -inf }
  0xee   : > { %v778_v28 = vmax.f32 %v2723_v32, %v777_v26  ;;  %v761_v3 = vmax.f32 %v2724_v50, %v760_v51 }
  0xef   : > { %v2352_v57 = vpop.permute.xlu1 %918  ;;  %v2354_v31 = vpop.permute.xlu0 %916 }
  0xf0   : > { %v779_v27 = vmax.f32 %v778_v28, %v776_v21  ;;  %v2356_v35 = vmax.f32 %v761_v3, %v759_v16 }
  0xf2   : > { %v781_v29 = vsub.f32 %v1894_v9, %v779_v27  ;;  %v783_v42 = vsub.f32 %v2065_v12, %v779_v27  ;;  %v785_v56 = vsub.f32 %v2132_v45, %v779_v27  ;;  %v787_v11 = vsub.f32 %v1770_v8, %v779_v27 }
  0xf3   : > { %v789_v34 = vsub.f32 %v2207_v13, %v779_v27  ;;  %v793_v15 = vsub.f32 %v2190_v0, %v779_v27  ;;  %v2364_v2 = vpop.permute.xlu1 %922  ;;  %v2366_v14 = vpop.permute.xlu0 %920  ;;  %v791_v19 = vsub.f32 %v2310_v41, %v779_v27  ;;  %v780_v12 = vsub.f32 %v1896_v10, %v2356_v35 }
  0xf4   : > { %v800_v46 = vmul.f32 1.442695, %v781_v29  ;;  %v804_v62 = vmul.f32 1.442695, %v783_v42  ;;  %v808_v59 = vmul.f32 1.442695, %v785_v56  ;;  %v795_v45 = vsub.f32 %v699_v61, %v779_v27 }
  0xf5   : > { %v812_v9 = vmul.f32 1.442695, %v787_v11  ;;  %v816_v8 = vmul.f32 1.442695, %v789_v34  ;;  %v782_v0 = vsub.f32 %v2071_v58, %v2356_v35  ;;  %v784_v13 = vsub.f32 %v2138_v52, %v2356_v35 }
  0xf6   : > { %1456 = vpow2.f32 %v800_v46  ;;  %v786_v41 = vsub.f32 %v1772_v37, %v2356_v35  ;;  %v820_v44 = vmul.f32 1.442695, %v791_v19  ;;  %v788_v10 = vsub.f32 %v2209_v20, %v2356_v35 }
  0xf7   : > { %1458 = vpow2.f32 %v804_v62  ;;  %v2377_v48 = vpop.permute.xlu1 %926  ;;  %v2379_v39 = vpop.permute.xlu0 %924  ;;  %v792_v61 = vsub.f32 %v2193_v5, %v2356_v35  ;;  %v824_v58 = vmul.f32 1.442695, %v793_v15  ;;  %v828_v17 = vmul.f32 1.442695, %v795_v45 }
  0xf8   : > { %1460 = vpow2.f32 %v808_v59  ;;  %v797_v6 = vsub.f32 %v745_v36, %v779_v27  ;;  %v798_v52 = vmul.f32 1.442695, %v780_v12  ;;  %v802_v24 = vmul.f32 1.442695, %v782_v0 }
  0xf9   : > { %1462 = vpow2.f32 %v812_v9  ;;  %v806_v47 = vmul.f32 1.442695, %v784_v13  ;;  %v790_v20 = vsub.f32 %v2312_v22, %v2356_v35  ;;  %v810_v4 = vmul.f32 1.442695, %v786_v41 }
  0xfa   : > { %1464 = vpow2.f32 %v816_v8  ;;  %v832_v5 = vmul.f32 1.442695, %v797_v6  ;;  %v814_v18 = vmul.f32 1.442695, %v788_v10  ;;  %v794_v60 = vsub.f32 %v2318_v63, %v2356_v35 }
  0xfb   : > { %v2385_v54 = vpop.permute.xlu1 %954  ;;  %v2387_v37 = vpop.permute.xlu0 %952  ;;  %1466 = vpow2.f32 %v820_v44  ;;  %v818_v26 = vmul.f32 1.442695, %v790_v20  ;;  %v796_v28 = vsub.f32 %v2331_v30, %v2356_v35  ;;  %v822_v50 = vmul.f32 1.442695, %v792_v61 }
  0xfc   : > { %1468 = vpow2.f32 %v824_v58  ;;  %v826_v42 = vmul.f32 1.442695, %v794_v60 }
  0xfd   : > { %1470 = vpow2.f32 %v828_v17  ;;  %v830_v15 = vmul.f32 1.442695, %v796_v28 }
  0xfe   : > { %1472 = vpow2.f32 %v798_v52 }
  0xff   : > { %v2391_v25 = vpop.permute.xlu1 %958  ;;  %v2393_v36 = vpop.permute.xlu0 %956  ;;  %1474 = vpow2.f32 %v802_v24 }
 0x100   : > { %1476 = vpow2.f32 %v806_v47 }
 0x101   : > { %1478 = vpow2.f32 %v810_v4 }
 0x102   : > { %1480 = vpow2.f32 %v832_v5 }
 0x103   : > { %v2397_v51 = vpop.eup %1456  ;;  %v2399_v21 = vpop.permute.xlu1 %962  ;;  %1482 = vpow2.f32 %v814_v18 }
 0x104   : > { %v2401_v22 = vpop.permute.xlu0 %960  ;;  %v2403_v16 = vpop.eup %1458  ;;  %v851_v32 = vsel %vm341_vm1, %v2397_v51, 0.0  ;;  %1484 = vpow2.f32 %v818_v26 }
 0x105   : > { %v2409_v63 = vpop.eup %1460  ;;  %v852_v3 = vsel %vm341_vm1, %v2403_v16, 0.0  ;;  %1486 = vpow2.f32 %v822_v50 }
 0x106   : > { %v2413_v27 = vpop.eup %1462  ;;  %v853_v29 = vadd.f32 %v852_v3, %v851_v32  ;;  %v854_v56 = vsel %vm341_vm1, %v2409_v63, 0.0  ;;  %1488 = vpow2.f32 %v826_v42 }
 0x107   : > { %v2417_v11 = vpop.permute.xlu1 %966  ;;  %v2421_v30 = vpop.eup %1464  ;;  %v856_v46 = vsel %vm341_vm1, %v2413_v27, 0.0  ;;  %1490 = vpow2.f32 %v830_v15 }
 0x108   : > { %v2419_v34 = vpop.permute.xlu0 %964  ;;  %v855_v35 = vadd.f32 %v854_v56, %v853_v29  ;;  %v2423_v19 = vpop.eup %1466  ;;  %v858_v12 = vsel %vm341_vm1, %v2421_v30, 0.0 }
 0x109   : > { %v2427_v62 = vpop.eup %1468  ;;  %v860_v44 = vsel %vm341_vm1, %v2423_v19, 0.0 }
 0x10a   : > { %v857_v59 = vadd.f32 %v856_v46, %v855_v35  ;;  %v2429_v9 = vpop.eup %1470  ;;  %v862_v52 = vsel %vm341_vm1, %v2427_v62, 0.0 }
 0x10b   : > { %v2433_v45 = vpop.permute.xlu1 %1042  ;;  %v2437_v0 = vpop.eup %1472  ;;  %v864_v26 = vsel %vm341_vm1, %v2429_v9, 0.0 }
 0x10c   : > { %v2435_v8 = vpop.permute.xlu0 %1040  ;;  %v859_v13 = vadd.f32 %v858_v12, %v857_v59  ;;  %v2439_v41 = vpop.eup %1474  ;;  %v834_v10 = vsel %vm341_vm1, %v2437_v0, 0.0 }
 0x10d   : > { %v2445_v61 = vpop.eup %1476  ;;  %v835_v17 = vsel %vm341_vm1, %v2439_v41, 0.0 }
 0x10e   : > { %v861_v58 = vadd.f32 %v860_v44, %v859_v13  ;;  %v2449_v6 = vpop.eup %1478  ;;  %v836_v24 = vadd.f32 %v835_v17, %v834_v10  ;;  %v837_v18 = vsel %vm341_vm1, %v2445_v61, 0.0 }
 0x10f   : > { %v2453_v47 = vpop.permute.xlu1 %1046  ;;  %v2457_v4 = vpop.eup %1480  ;;  %v839_v50 = vsel %vm341_vm1, %v2449_v6, 0.0 }
 0x110   : > { %v2455_v20 = vpop.permute.xlu0 %1044  ;;  %2725 = vst [vmem:[#allocation17_spill] sm:$0xff] %v2457_v4  ;;  %v863_v5 = vadd.f32 %v862_v52, %v861_v58  ;;  %v2461_v60 = vpop.eup %1482  ;;  %v838_v32 = vadd.f32 %v837_v18, %v836_v24  ;;  %v866_v29 = vsel %vm341_vm1, %v2457_v4, 0.0 }
 0x111   : > { %v2467_v3 = vpop.eup %1484  ;;  %v841_v46 = vsel %vm341_vm1, %v2461_v60, 0.0 }
 0x112   : > { %v865_v28 = vadd.f32 %v864_v26, %v863_v5  ;;  %v840_v42 = vadd.f32 %v839_v50, %v838_v32  ;;  %v2477_v59 = vpop.eup %1486  ;;  %v843_v13 = vsel %vm341_vm1, %v2467_v3, 0.0 }
 0x113   : > { %v2471_v56 = vpop.permute.xlu1 %1050  ;;  %2726 = vst [vmem:[#allocation18_spill] sm:$0xff] %v2477_v59  ;;  %v2481_v44 = vpop.eup %1488  ;;  %v845_v52 = vsel %vm341_vm1, %v2477_v59, 0.0 }
 0x114   : > { %v2473_v35 = vpop.permute.xlu0 %1048  ;;  %v867_v15 = vadd.f32 %v866_v29, %v865_v28  ;;  %v842_v12 = vadd.f32 %v841_v46, %v840_v42  ;;  %2727 = vst [vmem:[#allocation19_spill] sm:$0xff] %v2481_v44  ;;  %v2489_v24 = vpop.eup %1490  ;;  %v847_v18 = vsel %vm341_vm1, %v2481_v44, 0.0 }
 0x115   : > { %2728 = vst [vmem:[#allocation20_spill] sm:$0xff] %v2489_v24  ;;  %v849_v50 = vsel %vm341_vm1, %v2489_v24, 0.0 }
 0x116   : > { %1492 = vrcp.f32 %v867_v15  ;;  %v844_v10 = vadd.f32 %v843_v13, %v842_v12 }
 0x117   : > { %v2483_v58 = vpop.permute.xlu1 %1054 }
 0x118   : > { %v2485_v17 = vpop.permute.xlu0 %1052  ;;  %v846_v5 = vadd.f32 %v845_v52, %v844_v10 }
 0x11a   : > { %v848_v26 = vadd.f32 %v847_v18, %v846_v5 }
 0x11b   : > { %v2493_v32 = vpop.permute.xlu1 %1082 }
 0x11c   : > { %v2495_v28 = vpop.permute.xlu0 %1080  ;;  %v850_v29 = vadd.f32 %v849_v50, %v848_v26 }
 0x11e   : > { %1494 = vrcp.f32 %v850_v29 }
 0x11f   : > { %v2499_v42 = vpop.permute.xlu1 %1086 }
 0x120   : > { %v2501_v15 = vpop.permute.xlu0 %1084 }
 0x123   : > { %v2503_v46 = vpop.eup %1492  ;;  %v2505_v12 = vpop.permute.xlu1 %1090 }
 0x124   : > { %2729 = vst [vmem:[#allocation21_spill] sm:$0xff] %v2503_v46  ;;  %v2507_v13 = vpop.permute.xlu0 %1088  ;;  %v871_v10 = vmul.f32 %v2503_v46, %v2397_v51  ;;  %v873_v52 = vmul.f32 %v2503_v46, %v2403_v16  ;;  %v875_v5 = vmul.f32 %v2503_v46, %v2409_v63  ;;  %v877_v18 = vmul.f32 %v2503_v46, %v2413_v27  ;;  %v1496_v63 = vld [vmem:[%s1812_s11 + $0x8] sm:$0xff] }
 0x125   : > { %v2519_v26 = vmul.f32 %v2503_v46, %v2421_v30  ;;  %v2523_v50 = vmul.f32 %v2503_v46, %v2423_v19  ;;  %v2527_v51 = vmul.f32 %v2503_v46, %v2427_v62  ;;  %v2531_v16 = vmul.f32 %v2503_v46, %v2429_v9 }
 0x126   : > { %v889_v29 = vmul.f32 %v1496_v63, %v871_v10  ;;  %v937_v27 = vmul.f32 %v2333_v40, %v873_v52  ;;  %v891_v24 = vmul.f32 %v871_v10, %v1843_v23  ;;  %v939_v30 = vmul.f32 %v2352_v57, %v873_v52 }
 0x127   : > { %2730 = vst [vmem:[#allocation22_spill] sm:$0xff] %v2527_v51  ;;  %2731 = vst [vmem:[#allocation23_spill] sm:$0xff] %v2531_v16  ;;  %v893_v4 = vmul.f32 %v871_v10, %v1854_v33  ;;  %v941_v19 = vmul.f32 %v2364_v2, %v873_v52  ;;  %v895_v44 = vmul.f32 %v871_v10, %v1868_v53  ;;  %v2541_v59 = vpop.permute.xlu1 %1094 }
 0x128   : > { %v943_v62 = vmul.f32 %v2377_v48, %v873_v52  ;;  %v2543_v9 = vpop.permute.xlu0 %1092  ;;  %v945_v46 = vadd.f32 %v937_v27, %v889_v29  ;;  %v947_v63 = vadd.f32 %v939_v30, %v891_v24  ;;  %v977_v40 = vmul.f32 %v2385_v54, %v875_v5 }
 0x129   : > { %v979_v23 = vmul.f32 %v2391_v25, %v875_v5  ;;  %v949_v16 = vadd.f32 %v941_v19, %v893_v4  ;;  %v981_v33 = vmul.f32 %v2399_v21, %v875_v5  ;;  %v983_v2 = vmul.f32 %v2417_v11, %v875_v5  ;;  %v2733_v19 = vld [vmem:[#allocation7_spill] sm:$0xff] }
 0x12a   : > { %v951_v57 = vadd.f32 %v943_v62, %v895_v44  ;;  %v985_v51 = vadd.f32 %v977_v40, %v945_v46  ;;  %v1025_v48 = vmul.f32 %v1864_v38, %v877_v18  ;;  %v1065_v10 = vmul.f32 %v2433_v45, %v2519_v26 }
 0x12b   : > { %v987_v53 = vadd.f32 %v979_v23, %v947_v63  ;;  %v989_v52 = vadd.f32 %v981_v33, %v949_v16  ;;  %v1027_v24 = vmul.f32 %v1873_v55, %v877_v18  ;;  %v1067_v54 = vmul.f32 %v2453_v47, %v2519_v26  ;;  %v2555_v25 = vpop.permute.xlu1 %1166  ;;  %v2559_v21 = vpop.eup %1494  ;;  %v2734_v63 = vld [vmem:[#allocation8_spill] sm:$0xff] }
 0x12c   : > { %v991_v29 = vadd.f32 %v983_v2, %v951_v57  ;;  %v2557_v4 = vpop.permute.xlu0 %1164  ;;  %v1033_v11 = vadd.f32 %v1025_v48, %v985_v51  ;;  %v1029_v44 = vmul.f32 %v1883_v49, %v877_v18  ;;  %v1069_v38 = vmul.f32 %v2471_v56, %v2519_v26 }
 0x12d   : > { %v1031_v45 = vmul.f32 %v1891_v1, %v877_v18  ;;  %v869_v55 = vmul.f32 %v2559_v21, %v2437_v0  ;;  %v872_v47 = vmul.f32 %v2559_v21, %v2439_v41  ;;  %v874_v46 = vmul.f32 %v2559_v21, %v2445_v61  ;;  %v2732_v0 = vld [vmem:[#allocation6_spill] sm:$0xff] }
 0x12e   : > { %v876_v5 = vmul.f32 %v2559_v21, %v2449_v6  ;;  %v1073_v51 = vadd.f32 %v1065_v10, %v1033_v11  ;;  %v878_v49 = vmul.f32 %v2559_v21, %v2461_v60  ;;  %v1035_v16 = vadd.f32 %v1027_v24, %v987_v53 }
 0x12f   : > { %v1037_v56 = vadd.f32 %v1029_v44, %v989_v52  ;;  %v888_v1 = vmul.f32 %v869_v55, %v1989_v43  ;;  %v936_v18 = vmul.f32 %v2335_v7, %v872_v47  ;;  %v890_v27 = vmul.f32 %v869_v55, %v2732_v0  ;;  %v2579_v30 = vpop.permute.xlu1 %1170  ;;  %v2735_v52 = vld [vmem:[#allocation9_spill] sm:$0xff]  ;;  %v2737_v0 = vld [vmem:[#allocation11_spill] sm:$0xff] }
 0x130   : > { %v938_v41 = vmul.f32 %v2354_v31, %v872_v47  ;;  %v2581_v61 = vpop.permute.xlu0 %1168  ;;  %v892_v6 = vmul.f32 %v869_v55, %v2733_v19  ;;  %v940_v62 = vmul.f32 %v2366_v14, %v872_v47  ;;  %v894_v60 = vmul.f32 %v869_v55, %v2734_v63 }
 0x131   : > { %v942_v40 = vmul.f32 %v2379_v39, %v872_v47  ;;  %v944_v23 = vadd.f32 %v936_v18, %v888_v1  ;;  %v976_v7 = vmul.f32 %v2387_v37, %v874_v46  ;;  %v978_v57 = vmul.f32 %v2393_v36, %v874_v46  ;;  %v2736_v47 = vld [vmem:[#allocation10_spill] sm:$0xff] }
 0x132   : > { %v946_v43 = vadd.f32 %v938_v41, %v890_v27  ;;  %v948_v33 = vadd.f32 %v940_v62, %v892_v6  ;;  %v980_v2 = vmul.f32 %v2401_v22, %v874_v46  ;;  %v982_v53 = vmul.f32 %v2419_v34, %v874_v46  ;;  %v2738_v62 = vld [vmem:[#allocation12_spill] sm:$0xff] }
 0x133   : > { %v950_v31 = vadd.f32 %v942_v40, %v894_v60  ;;  %v984_v48 = vadd.f32 %v976_v7, %v944_v23  ;;  %v1024_v14 = vmul.f32 %v2735_v52, %v876_v5  ;;  %v1064_v24 = vmul.f32 %v2435_v8, %v878_v49  ;;  %v1175_v11 = vpop.permute.xlu1 %1174 }
 0x134   : > { %v986_v10 = vadd.f32 %v978_v57, %v946_v43  ;;  %v2593_v39 = vpop.permute.xlu0 %1172  ;;  %v988_v44 = vadd.f32 %v980_v2, %v948_v33  ;;  %v1075_v37 = vadd.f32 %v1067_v54, %v1035_v16  ;;  %v1026_v36 = vmul.f32 %v2736_v47, %v876_v5  ;;  %v2739_v2 = vld [vmem:[#allocation22_spill] sm:$0xff] }
 0x135   : > { %v990_v55 = vadd.f32 %v982_v53, %v950_v31  ;;  %v1032_v1 = vadd.f32 %v1024_v14, %v984_v48  ;;  %v1066_v18 = vmul.f32 %v2455_v20, %v878_v49  ;;  %v1077_v22 = vadd.f32 %v1069_v38, %v1037_v56  ;;  %v2742_v48 = vld [vmem:[#allocation18_spill] sm:$0xff]  ;;  %v2743_v14 = vld [vmem:[#allocation19_spill] sm:$0xff] }
 0x136   : > { %v1028_v34 = vmul.f32 %v2737_v0, %v876_v5  ;;  %v1034_v46 = vadd.f32 %v1026_v36, %v986_v10  ;;  %v1068_v27 = vmul.f32 %v2473_v35, %v878_v49  ;;  %v1039_v41 = vadd.f32 %v1031_v45, %v991_v29  ;;  %v2746_v47 = vld [vmem:[#allocation14_spill] sm:$0xff] }
 0x137   : > { %v1071_v8 = vmul.f32 %v2483_v58, %v2519_v26  ;;  %v1072_v19 = vadd.f32 %v1064_v24, %v1032_v1  ;;  %v1030_v63 = vmul.f32 %v2738_v62, %v876_v5  ;;  %v1070_v54 = vmul.f32 %v2485_v17, %v878_v49  ;;  %v1179_v16 = vpop.permute.xlu1 %1178  ;;  %v2748_v62 = vld [vmem:[#allocation15_spill] sm:$0xff] }
 0x138   : > { %v1036_v6 = vadd.f32 %v1028_v34, %v988_v44  ;;  %v1177_v60 = vpop.permute.xlu0 %1176  ;;  %v1074_v40 = vadd.f32 %v1066_v18, %v1034_v46  ;;  %v1105_v38 = vmul.f32 %v2493_v32, %v2523_v50  ;;  %v880_v35 = vmul.f32 %v2559_v21, %v2467_v3 }
 0x139   : > { %v1079_v20 = vadd.f32 %v1071_v8, %v1039_v41  ;;  %v1038_v45 = vadd.f32 %v1030_v63, %v990_v55  ;;  %v1107_v58 = vmul.f32 %v2499_v42, %v2523_v50  ;;  %v1109_v26 = vmul.f32 %v2505_v12, %v2523_v50  ;;  %v2745_v55 = vld [vmem:[#allocation13_spill] sm:$0xff] }
 0x13a   : > { %v1076_v29 = vadd.f32 %v1068_v27, %v1036_v6  ;;  %v1113_v5 = vadd.f32 %v1105_v38, %v1073_v51  ;;  %v1104_v17 = vmul.f32 %v2495_v28, %v880_v35  ;;  %v1106_v49 = vmul.f32 %v2501_v15, %v880_v35  ;;  %v2740_v28 = vld [vmem:[#allocation2_spill] sm:$0xff]  ;;  %v2741_v15 = vld [vmem:[#allocation23_spill] sm:$0xff] }
 0x13b   : > { %v1108_v56 = vmul.f32 %v2507_v13, %v880_v35  ;;  %v1078_v23 = vadd.f32 %v1070_v54, %v1038_v45  ;;  %v1115_v32 = vadd.f32 %v1107_v58, %v1075_v37  ;;  %v1117_v43 = vadd.f32 %v1109_v26, %v1077_v22  ;;  %v1207_v7 = vpop.permute.xlu1 %1206  ;;  %v2750_v26 = vld [vmem:[#allocation16_spill] sm:$0xff] }
 0x13c   : > { %v1111_v3 = vmul.f32 %v2541_v59, %v2523_v50  ;;  %v1205_v57 = vpop.permute.xlu0 %1204  ;;  %v1112_v33 = vadd.f32 %v1104_v17, %v1072_v19  ;;  %v1114_v42 = vadd.f32 %v1106_v49, %v1074_v40  ;;  %v1110_v12 = vmul.f32 %v2543_v9, %v880_v35  ;;  %v2744_v50 = vld [vmem:[#allocation3_spill] sm:$0xff]  ;;  %v2749_v40 = vld [vmem:[#allocation5_spill] sm:$0xff] }
 0x13d   : > { %v1116_v31 = vadd.f32 %v1108_v56, %v1076_v29  ;;  %v1149_v53 = vmul.f32 %v2740_v28, %v2739_v2  ;;  %v1189_v13 = vmul.f32 %v2555_v25, %v2741_v15  ;;  %v882_v10 = vmul.f32 %v2559_v21, %v2742_v48  ;;  %v2747_v25 = vld [vmem:[#allocation4_spill] sm:$0xff]  ;;  %v2751_v49 = vld [vmem:[#allocation17_spill] sm:$0xff] }
 0x13e   : > { %v1119_v51 = vadd.f32 %v1111_v3, %v1079_v20  ;;  %v1118_v52 = vadd.f32 %v1110_v12, %v1078_v23  ;;  %v884_v59 = vmul.f32 %v2559_v21, %v2743_v14  ;;  %v1151_v24 = vmul.f32 %v2744_v50, %v2739_v2  ;;  %v2752_v56 = vld [vmem:[#allocation21_spill] sm:$0xff] }
 0x13f   : > { %v1191_v9 = vmul.f32 %v2579_v30, %v2741_v15  ;;  %v1157_v44 = vadd.f32 %v1149_v53, %v1113_v5  ;;  %v1148_v37 = vmul.f32 %v2745_v55, %v882_v10  ;;  %v1150_v36 = vmul.f32 %v2746_v47, %v882_v10  ;;  %v1211_v18 = vpop.permute.xlu1 %1210 }
 0x140   : > { %v1153_v1 = vmul.f32 %v2747_v25, %v2739_v2  ;;  %v1209_v22 = vpop.permute.xlu0 %1208  ;;  %v1188_v0 = vmul.f32 %v2557_v4, %v884_v59  ;;  %v1159_v34 = vadd.f32 %v1151_v24, %v1115_v32  ;;  %v1190_v46 = vmul.f32 %v2581_v61, %v884_v59 }
 0x141   : > { %v1193_v27 = vmul.f32 %v1175_v11, %v2741_v15  ;;  %v1197_v41 = vadd.f32 %v1189_v13, %v1157_v44  ;;  %v1156_v8 = vadd.f32 %v1148_v37, %v1112_v33  ;;  %v1158_v30 = vadd.f32 %v1150_v36, %v1114_v42 }
 0x142   : > { %v1161_v19 = vadd.f32 %v1153_v1, %v1117_v43  ;;  %v1199_v6 = vadd.f32 %v1191_v9, %v1159_v34  ;;  %v1152_v63 = vmul.f32 %v2748_v62, %v882_v10  ;;  %v1192_v54 = vmul.f32 %v2593_v39, %v884_v59  ;;  %v2753_v39 = vld [vmem:[#allocation20_spill] sm:$0xff] }
 0x143   : > { %v1155_v20 = vmul.f32 %v2749_v40, %v2739_v2  ;;  %v1196_v38 = vadd.f32 %v1188_v0, %v1156_v8  ;;  %v1198_v35 = vadd.f32 %v1190_v46, %v1158_v30  ;;  %v1195_v29 = vmul.f32 %v1179_v16, %v2741_v15  ;;  %v1215_v61 = vpop.permute.xlu1 %1214 }
 0x144   : > { %v1201_v4 = vadd.f32 %v1193_v27, %v1161_v19  ;;  %v1213_v45 = vpop.permute.xlu0 %1212  ;;  %v1160_v11 = vadd.f32 %v1152_v63, %v1116_v31  ;;  %v1154_v5 = vmul.f32 %v2750_v26, %v882_v10  ;;  %v1194_v17 = vmul.f32 %v1177_v60, %v884_v59 }
 0x145   : > { %v1163_v58 = vadd.f32 %v1155_v20, %v1119_v51  ;;  %v887_v23 = vmul.f32 %v2752_v56, %v2751_v49  ;;  %v886_v32 = vmul.f32 %v2559_v21, %v2753_v39 }
 0x146   : > { %v1200_v43 = vadd.f32 %v1192_v54, %v1160_v11  ;;  %v1162_v33 = vadd.f32 %v1154_v5, %v1118_v52 }
 0x147   : > { %v1203_v3 = vadd.f32 %v1195_v29, %v1163_v58  ;;  %v1229_v42 = vmul.f32 %v1207_v7, %v887_v23  ;;  %v1228_v12 = vmul.f32 %v1205_v57, %v886_v32  ;;  %v1231_v16 = vmul.f32 %v1211_v18, %v887_v23  ;;  %v1219_v28 = vpop.permute.xlu1 %1218 }
 0x148   : > { %v1230_v2 = vmul.f32 %v1209_v22, %v886_v32  ;;  %v1217_v31 = vpop.permute.xlu0 %1216  ;;  %v1202_v53 = vadd.f32 %v1194_v17, %v1162_v33  ;;  %v1233_v60 = vmul.f32 %v1215_v61, %v887_v23  ;;  %v1232_v51 = vmul.f32 %v1213_v45, %v886_v32 }
 0x149   : > { %v1235_v15 = vmul.f32 %v1219_v28, %v887_v23  ;;  %v1237_v13 = vadd.f32 %v1229_v42, %v1197_v41  ;;  %v1236_v21 = vadd.f32 %v1228_v12, %v1196_v38  ;;  %v1239_v48 = vadd.f32 %v1231_v16, %v1199_v6 }
 0x14a   : > { %v1238_v10 = vadd.f32 %v1230_v2, %v1198_v35  ;;  %v1241_v52 = vadd.f32 %v1233_v60, %v1201_v4  ;;  %v1240_v7 = vadd.f32 %v1232_v51, %v1200_v43  ;;  %v1234_v14 = vmul.f32 %v1217_v31, %v886_v32 }
 0x14b   : > { %v1243_v57 = vadd.f32 %v1235_v15, %v1203_v3  ;;  %1245 = vst.msk [vmem:[%s291_s19 + $0x8] sm:$0xff] %vm341_vm1, %v1237_v13  ;;  %1244 = vst.msk [vmem:[%s291_s19] sm:$0xff] %vm341_vm1, %v1236_v21 }
 0x14c   : > { %1247 = vst.msk [vmem:[%s291_s19 + $0x18] sm:$0xff] %vm341_vm1, %v1239_v48  ;;  %1246 = vst.msk [vmem:[%s291_s19 + $0x10] sm:$0xff] %vm341_vm1, %v1238_v10  ;;  %v1242_v59 = vadd.f32 %v1234_v14, %v1202_v53 }
 0x14d   : > { %1249 = vst.msk [vmem:[%s291_s19 + $0x28] sm:$0xff] %vm341_vm1, %v1241_v52  ;;  %1248 = vst.msk [vmem:[%s291_s19 + $0x20] sm:$0xff] %vm341_vm1, %v1240_v7 }
 0x14e   : > { %1251 = vst.msk [vmem:[%s291_s19 + $0x38] sm:$0xff] %vm341_vm1, %v1243_v57  ;;  %1250 = vst.msk [vmem:[%s291_s19 + $0x30] sm:$0xff] %vm341_vm1, %v1242_v59 }
 0x14f PF: > { %s13_s16 = sadd.s32 1, %s1535_s16   ;;  %s2754_s12 = smov %s1527_s14 }
 0x150   : > { %p10_p7 = scmp.ge.s32.totalorder %s13_s16, 6   ;;  %s2755_s13 = smov %s1531_s15 }
 0x151   : > { %s2756_s14 = smov %s2759_s17  ;;  %s2757_s15 = smov %s2763_s18 }
 0x152   :  { %12 = sbr.rel (!%p10_p7) target bundleno = 3 (0x3), region = 68 }

</bundles_post_ra>
